<compile_context>
chip_gen: v5e
topology: v5e:2x2
jax: 0.10.0
libtpu: 0.0.40
codegen_flags: <defaults>
</compile_context>

<pallas_src>
import jax
import jax.numpy as jnp
from jax.experimental import pallas as pl
from jax.experimental.pallas import tpu as pltpu

# ---- ScConv hyper-parameters (from the module __init__) --------------------
EMBED_DIM   = 16      # embed_dim == op_channel (small demo size)
GN_GROUPS   = 4       # ScConv default group_num
GN_EPS      = 1e-5
GATE_THRESH = 0.5
ALPHA       = 0.5
SQUEEZE     = 2
CONV_GROUPS = 2       # group_size
KSIZE       = 3       # group_kernel_size

# The in-kernel gate uses an exact sign test (sigmoid(t) >= 0.5  <=>  t >= 0);
# that substitution is only valid for a threshold of exactly 0.5.
assert GATE_THRESH == 0.5, "sign-test gate requires gate_treshold == 0.5"


# ---------------------------------------------------------------------------
# Pallas kernel: Bt batch elements per grid step, full SRU + CRU + residual,
# cls-token passthrough handled inside the kernel.
# ---------------------------------------------------------------------------
def _make_kernel(H, W, C, Bt):
    HW = H * W
    up_ch = int(ALPHA * C)
    low_ch = C - up_ch
    up_sq = up_ch // SQUEEZE
    low_sq = low_ch // SQUEEZE
    cout = C
    cg = C // GN_GROUPS
    half = C // 2
    taps = [(dh, dw) for dh in (-1, 0, 1) for dw in (-1, 0, 1)]

    # halo-padded scratch geometry along the flattened H*W axis.  The halo is
    # never initialized; out-of-bounds taps are masked with jnp.where, the
    # halo rows only keep the 9 static slice reads in-bounds.
    halo = W + 1
    pad_lo = ((halo + 7) // 8) * 8          # sublane-aligned start of the body
    total = pad_lo + HW + halo

    def kernel(x_ref, gamma_ref, beta_ref, gsel_ref, gselt_ref,
               wsq_ref, w2_ref, b2_ref, out_ref, pad_ref):
        # cls-token passthrough: direct store, no f32 round trip, no concat.
        out_ref[:, 0:1, :] = x_ref[:, 0:1, :].astype(out_ref.dtype)

        feat = x_ref[:, 1:, :].astype(jnp.float32)   # (Bt, HW, C), row = h*W + w

        gamma = gamma_ref[...]                       # (1, C)
        beta = beta_ref[...]                         # (1, C)

        # ---------------- SRU: single-pass GroupNorm + gating --------------
        s1 = jnp.sum(feat, axis=1)                   # (Bt, C) per-channel sum
        s2 = jnp.sum(feat * feat, axis=1)            # (Bt, C) per-channel sum sq
        gsel = gsel_ref[...]                         # (C, G) group indicator
        gselt = gselt_ref[...]                       # (G, C)
        inv_cnt = 1.0 / float(HW * cg)
        gmu = jnp.dot(s1, gsel, preferred_element_type=jnp.float32) * inv_cnt
        gms = jnp.dot(s2, gsel, preferred_element_type=jnp.float32) * inv_cnt
        gvar = jnp.maximum(gms - gmu * gmu, 0.0)     # clamp: E[x^2]-E[x]^2 >= 0
        grstd = jax.lax.rsqrt(gvar + GN_EPS)         # (Bt, G)
        mu_c = jnp.dot(gmu, gselt, preferred_element_type=jnp.float32)      # (Bt, C)
        rstd_c = jnp.dot(grstd, gselt, preferred_element_type=jnp.float32)  # (Bt, C)
        # fold the affine: gn = feat*scale + shift  (2 passes instead of 5)
        scale = rstd_c * gamma                       # (Bt, C)
        shift = beta - mu_c * scale                  # (Bt, C)
        gn = feat * scale[:, None, :] + shift[:, None, :]

        # sigmoid(t) >= 0.5  <=>  t >= 0  (exact because GATE_THRESH == 0.5)
        w_gamma = gamma / jnp.sum(gamma)
        info = (gn * w_gamma) >= 0.0
        x1 = jnp.where(info, gn, 0.0)
        x2 = gn - x1                                 # complementary mask
        # half-channel swap of x2 and add
        x2_swap = jnp.concatenate([x2[..., half:], x2[..., :half]], axis=-1)
        x_sru = x1 + x2_swap                         # (Bt, HW, C)

        # ---------------- CRU ----------------------------------------------
        xf = x_sru.reshape(Bt * HW, C)
        # fused block-diagonal squeeze: one matmul produces [up_s | low_s]
        sq_all = jnp.dot(xf, wsq_ref[...],
                         preferred_element_type=jnp.float32)   # (Bt*HW, up_sq+low_sq)
        up_s3 = sq_all[:, :up_sq].reshape(Bt, HW, up_sq)
        low_s3 = sq_all[:, up_sq:].reshape(Bt, HW, low_sq)

        # body of the halo scratch (sublane-aligned store); halos stay as-is.
        pad_ref[:, pad_lo:pad_lo + HW, :] = up_s3

        # boundary masks from one (1, HW, up_sq) iota (no Bt-sized iota)
        idx = jax.lax.broadcasted_iota(jnp.int32, (1, HW, up_sq), 1)
        col = idx % W
        not_top = idx >= W                 # valid tap when dh == -1
        not_bot = idx < (H - 1) * W        # valid tap when dh == +1
        not_lft = col != 0                 # valid tap when dw == -1
        not_rgt = col != W - 1             # valid tap when dw == +1

        def tap_mask(dh, dw):
            m = None
            if dh == -1:
                m = not_top
            elif dh == 1:
                m = not_bot
            if dw == -1:
                m = not_lft if m is None else (m & not_lft)
            elif dw == 1:
                m = not_rgt if m is None else (m & not_rgt)
            return m

        pieces = []
        for (dh, dw) in taps:
            start = pad_lo + dh * W + dw
            tap = pad_ref[:, start:start + HW, :]              # (Bt, HW, up_sq)
            m = tap_mask(dh, dw)
            if m is not None:
                # select (not multiply): halo garbage / wrapped reads -> 0.0
                tap = jnp.where(m, tap, 0.0)
            pieces.append(tap)
        pieces.append(low_s3)
        operand = jnp.concatenate(pieces, axis=-1).reshape(
            Bt * HW, KSIZE * KSIZE * up_sq + low_sq)

        # single fused matmul: [grouped 3x3 conv + PWC1 + bias | PWC2 | low_s]
        # -> yall = [y1 | y2], shape (Bt*HW, 2*cout)
        yall = jnp.dot(operand, w2_ref[...],
                       preferred_element_type=jnp.float32) + b2_ref[...]
        yall = yall.reshape(Bt, HW, 2 * cout)

        # channel-softmax fuse directly on the [y1|y2] slab
        pooled = jnp.mean(yall, axis=1)                        # (Bt, 2C)
        m = jnp.max(pooled, axis=-1, keepdims=True)
        e = jnp.exp(pooled - m)
        soft = e / jnp.sum(e, axis=-1, keepdims=True)
        cru = (yall[:, :, :cout] * soft[:, None, :cout]
               + yall[:, :, cout:] * soft[:, None, cout:])

        # residual (nearest interpolate to same size == identity); direct store
        out_ref[:, 1:, :] = (feat + cru).astype(out_ref.dtype)

    return kernel, total


# ---------------------------------------------------------------------------
# Parameter init (deterministic, torch layouts) + kernel-layout conversion.
# ---------------------------------------------------------------------------
def init_params(key, C):
    up_ch = int(ALPHA * C); low_ch = C - up_ch
    up_sq = up_ch // SQUEEZE; low_sq = low_ch // SQUEEZE
    cout = C
    cin_pg = up_sq // CONV_GROUPS
    ks = jax.random.split(key, 8)
    return {
        'gamma': 1.0 + 0.1 * jax.random.normal(ks[0], (C,), jnp.float32),
        'beta':  0.02 * jax.random.normal(ks[1], (C,), jnp.float32),
        'sq1':   0.2 * jax.random.normal(ks[2], (up_sq, up_ch), jnp.float32),
        'sq2':   0.2 * jax.random.normal(ks[3], (low_sq, low_ch), jnp.float32),
        'gwc_w': 0.2 * jax.random.normal(ks[4], (cout, cin_pg, KSIZE, KSIZE),
                                         jnp.float32),
        'gwc_b': 0.02 * jax.random.normal(ks[5], (cout,), jnp.float32),
        'pwc1':  0.2 * jax.random.normal(ks[6], (cout, up_sq), jnp.float32),
        'pwc2':  0.2 * jax.random.normal(ks[7], (cout - low_sq, low_sq),
                                         jnp.float32),
    }


def _kernel_params(p, C):
    up_ch = int(ALPHA * C); low_ch = C - up_ch
    up_sq = up_ch // SQUEEZE; low_sq = low_ch // SQUEEZE
    cout = C
    cin_pg = up_sq // CONV_GROUPS
    cout_pg = cout // CONV_GROUPS
    cg = C // GN_GROUPS

    kp = {
        'gamma': p['gamma'].reshape(1, C),
        'beta':  p['beta'].reshape(1, C),
        'b2':    jnp.concatenate(
            [p['gwc_b'], jnp.zeros((cout,), jnp.float32)]).reshape(1, 2 * cout),
    }

    # fused squeeze weight (block diagonal): [up_s | low_s] = xf @ wsq
    wsq = jnp.zeros((C, up_sq + low_sq), jnp.float32)
    wsq = wsq.at[:up_ch, :up_sq].set(p['sq1'].T)
    wsq = wsq.at[up_ch:, up_sq:].set(p['sq2'].T)
    kp['wsq'] = wsq

    # grouped 3x3 conv expanded to dense (K, K, up_sq, cout); PWC1 folded into
    # the centre tap; then combined with [PWC2 | I] (the y2 branch) into a
    # single (9*up_sq + low_sq, 2*cout) weight producing [y1 | y2].
    dense = jnp.zeros((KSIZE, KSIZE, up_sq, cout), jnp.float32)
    for g in range(CONV_GROUPS):
        wg = p['gwc_w'][g * cout_pg:(g + 1) * cout_pg]   # (cout_pg, cin_pg, K, K)
        dense = dense.at[:, :, g * cin_pg:(g + 1) * cin_pg,
                         g * cout_pg:(g + 1) * cout_pg].set(
            jnp.transpose(wg, (2, 3, 1, 0)))
    wf = dense.reshape(KSIZE * KSIZE, up_sq, cout)
    wf = wf.at[(KSIZE * KSIZE) // 2].add(p['pwc1'].T)    # centre tap == up_s
    wf = wf.reshape(KSIZE * KSIZE * up_sq, cout)

    y2_w = jnp.concatenate([p['pwc2'].T,
                            jnp.eye(low_sq, dtype=jnp.float32)], axis=1)  # (low_sq, cout)

    w2 = jnp.zeros((KSIZE * KSIZE * up_sq + low_sq, 2 * cout), jnp.float32)
    w2 = w2.at[:KSIZE * KSIZE * up_sq, :cout].set(wf)
    w2 = w2.at[KSIZE * KSIZE * up_sq:, cout:].set(y2_w)
    kp['w2'] = w2

    # GroupNorm group indicator matrices (channel -> group and back)
    ch = jnp.arange(C)
    gsel = (ch[:, None] // cg == jnp.arange(GN_GROUPS)[None, :]).astype(jnp.float32)
    kp['gsel'] = gsel                                    # (C, G)
    kp['gselT'] = gsel.T                                 # (G, C)
    return kp


# ---------------------------------------------------------------------------
# Generation-aware batch-tile / VMEM heuristics.
# ---------------------------------------------------------------------------
def _tpu_vmem_and_multistep():
    """Returns (per-core VMEM bytes, prefer >= 2 grid steps)."""
    vmem = 128 * 1024 * 1024
    cores = 1
    try:
        info = pltpu.get_tpu_info()
        vmem = int(getattr(info, "vmem_capacity_bytes", vmem))
        cores = int(getattr(info, "num_cores", 1))
    except Exception:
        pass
    # v7x: 64 MiB VMEM per TensorCore, 2 TCs per chip -> keep >= 2 grid steps.
    prefer_multi = (cores > 1) or (vmem <= 64 * 1024 * 1024)
    return vmem, prefer_multi


def _choose_bt(B, HW, C, budget, prefer_multi):
    lane = lambda c: ((c + 127) // 128) * 128 * 4        # f32 bytes per row
    up_sq = (C // 2) // SQUEEZE
    ops_w = KSIZE * KSIZE * up_sq + (C - C // 2) // SQUEEZE
    per_sample = (4 * (HW + 1) * lane(C)                 # in/out blocks, dbl-buffered
                  + 14 * HW * lane(C)                    # live f32 (HW, C) temporaries
                  + 3 * HW * lane(ops_w)                 # taps / operand / [y1|y2]
                  + (HW + 32) * lane(up_sq))             # halo scratch (lane-padded)
    cap = max(1, budget // max(per_sample, 1))
    divs = [d for d in range(1, B + 1) if B % d == 0 and d <= cap]
    if not divs:
        return 1
    if prefer_multi:
        multi = [d for d in divs if B // d >= 2]
        if multi:
            return max(multi)
    return max(divs)


# ---------------------------------------------------------------------------
# Wrapper: single pallas_call over the full (B, N, C) tensor.
# ---------------------------------------------------------------------------
def conditional_position_encoding(x, hw_shape, params, *, bt=None):
    B, N, C = x.shape
    H, W = hw_shape
    if N > H * W + 1:
        raise ValueError(f'Sequence length N ({N}) does not match H*W ({H * W})')
    assert N == H * W + 1, "expects one cls token + H*W feature tokens"
    assert C % 2 == 0 and C % GN_GROUPS == 0, "C must divide the GN groups / half-swap"
    up_ch = int(ALPHA * C); low_ch = C - up_ch
    assert up_ch % SQUEEZE == 0 and low_ch % SQUEEZE == 0, "squeeze_radio split"
    up_sq = up_ch // SQUEEZE; low_sq = low_ch // SQUEEZE
    assert up_sq % CONV_GROUPS == 0 and C % CONV_GROUPS == 0, "grouped-conv split"
    HW = H * W
    cout = C

    vmem_cap, prefer_multi = _tpu_vmem_and_multistep()
    if bt is None:
        budget = min(vmem_cap // 4, 24 * 1024 * 1024)
        bt = _choose_bt(B, HW, C, budget, prefer_multi)
    assert B % bt == 0, "batch tile must divide batch"

    kp = _kernel_params(params, C)
    kernel, pad_rows = _make_kernel(H, W, C, bt)

    def const(shape):
        return pl.BlockSpec(shape, lambda b, _s=shape: (0,) * len(_s))

    vmem_limit = int(min(vmem_cap // 2, 64 * 1024 * 1024))

    out = pl.pallas_call(
        kernel,
        out_shape=jax.ShapeDtypeStruct((B, N, C), x.dtype),
        grid_spec=pltpu.PrefetchScalarGridSpec(
            num_scalar_prefetch=0,
            grid=(B // bt,),
            in_specs=[
                pl.BlockSpec((bt, N, C), lambda b: (b, 0, 0)),    # tokens
                const((1, C)), const((1, C)),                     # gamma, beta
                const((C, GN_GROUPS)), const((GN_GROUPS, C)),     # group indicators
                const((C, up_sq + low_sq)),                       # fused squeeze
                const((KSIZE * KSIZE * up_sq + low_sq, 2 * cout)),  # fused conv/pwc
                const((1, 2 * cout)),                             # fused bias
            ],
            out_specs=pl.BlockSpec((bt, N, C), lambda b: (b, 0, 0)),
            scratch_shapes=[pltpu.VMEM((bt, pad_rows, up_sq), jnp.float32)],
        ),
        compiler_params=pltpu.CompilerParams(
            dimension_semantics=("parallel",),
            vmem_limit_bytes=vmem_limit),
    )(x, kp['gamma'], kp['beta'], kp['gsel'], kp['gselT'],
      kp['wsq'], kp['w2'], kp['b2'])
    return out


# ---------------------------------------------------------------------------
# Pure-JAX reference (NCHW, mirrors the PyTorch forward) for verification.
# ---------------------------------------------------------------------------
def ref_forward(x, hw_shape, p):
    B, N, C = x.shape
    H, W = hw_shape
    feat = x[:, 1:, :]
    cnn = jnp.transpose(feat, (0, 2, 1)).reshape(B, C, H, W)
    # SRU
    cg = C // GN_GROUPS
    xg = cnn.reshape(B, GN_GROUPS, cg * H * W)
    mu = xg.mean(-1, keepdims=True)
    var = jnp.mean((xg - mu) ** 2, axis=-1, keepdims=True)
    gn = ((xg - mu) / jnp.sqrt(var + GN_EPS)).reshape(B, C, H, W)
    gn = gn * p['gamma'][None, :, None, None] + p['beta'][None, :, None, None]
    w_gamma = (p['gamma'] / p['gamma'].sum())[None, :, None, None]
    rw = jax.nn.sigmoid(gn * w_gamma)
    info = rw >= GATE_THRESH
    x1 = jnp.where(info, gn, 0.0)
    x2 = jnp.where(info, 0.0, gn)
    half = C // 2
    xs = jnp.concatenate([x1[:, :half] + x2[:, half:],
                          x1[:, half:] + x2[:, :half]], axis=1)
    # CRU
    up_ch = int(ALPHA * C)
    up, low = xs[:, :up_ch], xs[:, up_ch:]
    c1 = lambda t, w: jnp.einsum('bchw,oc->bohw', t, w)
    up_s, low_s = c1(up, p['sq1']), c1(low, p['sq2'])
    gwc = jax.lax.conv_general_dilated(
        up_s, p['gwc_w'], (1, 1), ((1, 1), (1, 1)),
        dimension_numbers=('NCHW', 'OIHW', 'NCHW'),
        feature_group_count=CONV_GROUPS) + p['gwc_b'][None, :, None, None]
    y1 = gwc + c1(up_s, p['pwc1'])
    y2 = jnp.concatenate([c1(low_s, p['pwc2']), low_s], axis=1)
    out = jnp.concatenate([y1, y2], axis=1)
    soft = jax.nn.softmax(out.mean(axis=(2, 3), keepdims=True), axis=1)
    out = soft * out
    cru = out[:, :C] + out[:, C:]
    res = cnn + cru
    res = res.reshape(B, C, H * W).transpose(0, 2, 1)
    return jnp.concatenate([x[:, :1, :], res], axis=1)


if __name__ == "__main__":
    B, H, W = 2, 8, 8
    C = EMBED_DIM
    N = H * W + 1

    key = jax.random.PRNGKey(0)
    kx, kparam = jax.random.split(key)
    x = jax.random.normal(kx, (B, N, C), jnp.float32)
    params = init_params(kparam, C)

    out = conditional_position_encoding(x, (H, W), params)
    out = jax.block_until_ready(out)
    assert out.shape == (B, N, C)

    ref = ref_forward(x, (H, W), params)
    max_err = float(jnp.max(jnp.abs(out - ref)))
    assert max_err < 1e-4, f"kernel/reference mismatch: {max_err}"
    print("KERNEL_OK")
</pallas_src>

<mosaic_0001>
module attributes {stable_mosaic.version = 11 : i64} {
  func.func @kernel(%arg0: i32, %arg1: memref<2x65x16xf32, #tpu.memory_space<vmem>>, %arg2: memref<1x16xf32, #tpu.memory_space<vmem>>, %arg3: memref<1x16xf32, #tpu.memory_space<vmem>>, %arg4: memref<16x4xf32, #tpu.memory_space<vmem>>, %arg5: memref<4x16xf32, #tpu.memory_space<vmem>>, %arg6: memref<16x8xf32, #tpu.memory_space<vmem>>, %arg7: memref<40x32xf32, #tpu.memory_space<vmem>>, %arg8: memref<1x32xf32, #tpu.memory_space<vmem>>, %arg9: memref<2x65x16xf32, #tpu.memory_space<vmem>>, %arg10: memref<2x89x4xf32, #tpu.memory_space<vmem>>) attributes {dimension_semantics = [#tpu.dimension_semantics<parallel>], iteration_bounds = array<i64: 1>, scalar_prefetch = 0 : i64, scratch_operands = 1 : i64, tpu.core_type = #tpu.core_type<tc>, window_params = [{transform_indices = @transform_0, window_bounds = array<i64: 2, 65, 16>}, {pipeline_mode = #tpu.pipeline_mode<synchronous>, transform_indices = @transform_1, window_bounds = array<i64: 1, 16>}, {pipeline_mode = #tpu.pipeline_mode<synchronous>, transform_indices = @transform_2, window_bounds = array<i64: 1, 16>}, {pipeline_mode = #tpu.pipeline_mode<synchronous>, transform_indices = @transform_3, window_bounds = array<i64: 16, 4>}, {pipeline_mode = #tpu.pipeline_mode<synchronous>, transform_indices = @transform_4, window_bounds = array<i64: 4, 16>}, {pipeline_mode = #tpu.pipeline_mode<synchronous>, transform_indices = @transform_5, window_bounds = array<i64: 16, 8>}, {pipeline_mode = #tpu.pipeline_mode<synchronous>, transform_indices = @transform_6, window_bounds = array<i64: 40, 32>}, {pipeline_mode = #tpu.pipeline_mode<synchronous>, transform_indices = @transform_7, window_bounds = array<i64: 1, 32>}, {transform_indices = @transform_8, window_bounds = array<i64: 2, 65, 16>}]} {
    %c0 = arith.constant 0 : index
    %c0_0 = arith.constant 0 : index
    %c0_1 = arith.constant 0 : index
    %0 = vector.load %arg1[%c0, %c0_0, %c0_1] : memref<2x65x16xf32, #tpu.memory_space<vmem>>, vector<2x1x16xf32>
    %c0_2 = arith.constant 0 : index
    %c0_3 = arith.constant 0 : index
    %c0_4 = arith.constant 0 : index
    %1 = vector.load %arg9[%c0_2, %c0_3, %c0_4] : memref<2x65x16xf32, #tpu.memory_space<vmem>>, vector<2x1x16xf32>
    tpu.vector_store %arg9[%c0_2, %c0_3, %c0_4], %0 {strides = array<i32>} : memref<2x65x16xf32, #tpu.memory_space<vmem>>, vector<2x1x16xf32>,
    %c0_5 = arith.constant 0 : index
    %c1 = arith.constant 1 : index
    %c0_6 = arith.constant 0 : index
    %2 = vector.load %arg1[%c0_5, %c1, %c0_6] : memref<2x65x16xf32, #tpu.memory_space<vmem>>, vector<2x64x16xf32>
    %c0_7 = arith.constant 0 : index
    %c0_8 = arith.constant 0 : index
    %3 = vector.load %arg2[%c0_7, %c0_8] : memref<1x16xf32, #tpu.memory_space<vmem>>, vector<1x16xf32>
    %c0_9 = arith.constant 0 : index
    %c0_10 = arith.constant 0 : index
    %4 = vector.load %arg3[%c0_9, %c0_10] : memref<1x16xf32, #tpu.memory_space<vmem>>, vector<1x16xf32>
    %cst = arith.constant dense<0.000000e+00> : vector<2x16xf32>
    %5 = vector.multi_reduction <add>, %2, %cst [1] : vector<2x64x16xf32> to vector<2x16xf32>
    %6 = arith.mulf %2, %2 : vector<2x64x16xf32>
    %cst_11 = arith.constant dense<0.000000e+00> : vector<2x16xf32>
    %7 = vector.multi_reduction <add>, %6, %cst_11 [1] : vector<2x64x16xf32> to vector<2x16xf32>
    %c0_12 = arith.constant 0 : index
    %c0_13 = arith.constant 0 : index
    %8 = vector.load %arg4[%c0_12, %c0_13] : memref<16x4xf32, #tpu.memory_space<vmem>>, vector<16x4xf32>
    %c0_14 = arith.constant 0 : index
    %c0_15 = arith.constant 0 : index
    %9 = vector.load %arg5[%c0_14, %c0_15] : memref<4x16xf32, #tpu.memory_space<vmem>>, vector<4x16xf32>
    %cst_16 = arith.constant dense<0.000000e+00> : vector<2x4xf32>
    %10 = tpu.matmul %5, %8, %cst_16 {dimension_numbers = #tpu.dot_dimension_numbers<[1], [0], [0], [1], [0, 0, 1, 1], [], []>} : vector<2x16xf32>, vector<16x4xf32>, vector<2x4xf32> -> vector<2x4xf32>
    %cst_17 = arith.constant 3.906250e-03 : f32
    %11 = vector.broadcast %cst_17 : f32 to vector<2x4xf32>
    %12 = arith.mulf %10, %11 : vector<2x4xf32>
    %cst_18 = arith.constant dense<0.000000e+00> : vector<2x4xf32>
    %13 = tpu.matmul %7, %8, %cst_18 {dimension_numbers = #tpu.dot_dimension_numbers<[1], [0], [0], [1], [0, 0, 1, 1], [], []>} : vector<2x16xf32>, vector<16x4xf32>, vector<2x4xf32> -> vector<2x4xf32>
    %cst_19 = arith.constant 3.906250e-03 : f32
    %14 = vector.broadcast %cst_19 : f32 to vector<2x4xf32>
    %15 = arith.mulf %13, %14 : vector<2x4xf32>
    %16 = arith.mulf %12, %12 : vector<2x4xf32>
    %17 = arith.subf %15, %16 : vector<2x4xf32>
    %cst_20 = arith.constant 0.000000e+00 : f32
    %18 = vector.broadcast %cst_20 : f32 to vector<2x4xf32>
    %19 = arith.maximumf %17, %18 : vector<2x4xf32>
    %cst_21 = arith.constant 9.99999974E-6 : f32
    %20 = vector.broadcast %cst_21 : f32 to vector<2x4xf32>
    %21 = arith.addf %19, %20 : vector<2x4xf32>
    %22 = math.rsqrt %21 : vector<2x4xf32>
    %cst_22 = arith.constant dense<0.000000e+00> : vector<2x16xf32>
    %23 = tpu.matmul %12, %9, %cst_22 {dimension_numbers = #tpu.dot_dimension_numbers<[1], [0], [0], [1], [0, 0, 1, 1], [], []>} : vector<2x4xf32>, vector<4x16xf32>, vector<2x16xf32> -> vector<2x16xf32>
    %cst_23 = arith.constant dense<0.000000e+00> : vector<2x16xf32>
    %24 = tpu.matmul %22, %9, %cst_23 {dimension_numbers = #tpu.dot_dimension_numbers<[1], [0], [0], [1], [0, 0, 1, 1], [], []>} : vector<2x4xf32>, vector<4x16xf32>, vector<2x16xf32> -> vector<2x16xf32>
    %25 = vector.broadcast %3 : vector<1x16xf32> to vector<2x16xf32>
    %26 = arith.mulf %24, %25 : vector<2x16xf32>
    %27 = arith.mulf %23, %26 : vector<2x16xf32>
    %28 = vector.broadcast %4 : vector<1x16xf32> to vector<2x16xf32>
    %29 = arith.subf %28, %27 : vector<2x16xf32>
    %30 = vector.shape_cast %26 : vector<2x16xf32> to vector<2x1x16xf32>
    %31 = vector.broadcast %30 : vector<2x1x16xf32> to vector<2x64x16xf32>
    %32 = arith.mulf %2, %31 : vector<2x64x16xf32>
    %33 = vector.shape_cast %29 : vector<2x16xf32> to vector<2x1x16xf32>
    %34 = vector.broadcast %33 : vector<2x1x16xf32> to vector<2x64x16xf32>
    %35 = arith.addf %32, %34 : vector<2x64x16xf32>
    %36 = vector.shape_cast %3 : vector<1x16xf32> to vector<1x1x16xf32>
    %cst_24 = arith.constant dense<0.000000e+00> : vector<1xf32>
    %37 = vector.multi_reduction <add>, %36, %cst_24 [1, 2] : vector<1x1x16xf32> to vector<1xf32>
    %38 = vector.shape_cast %37 : vector<1xf32> to vector<1x1x1xf32>
    %39 = vector.extract %38[0, 0, 0] : f32 from vector<1x1x1xf32>
    %40 = vector.broadcast %39 : f32 to vector<1x16xf32>
    %41 = arith.divf %3, %40 : vector<1x16xf32>
    %42 = vector.shape_cast %41 : vector<1x16xf32> to vector<1x1x16xf32>
    %43 = vector.broadcast %42 : vector<1x1x16xf32> to vector<2x64x16xf32>
    %44 = arith.mulf %35, %43 : vector<2x64x16xf32>
    %cst_25 = arith.constant 0.000000e+00 : f32
    %45 = vector.broadcast %cst_25 : f32 to vector<2x64x16xf32>
    %46 = arith.cmpf oge, %44, %45 : vector<2x64x16xf32>
    %cst_26 = arith.constant 0.000000e+00 : f32
    %47 = vector.broadcast %cst_26 : f32 to vector<2x64x16xf32>
    %48 = arith.select %46, %35, %47 : vector<2x64x16xi1>, vector<2x64x16xf32>
    %49 = arith.subf %35, %48 : vector<2x64x16xf32>
    %50 = vector.extract_strided_slice %49 {offsets = [0, 0, 8], sizes = [2, 64, 8], strides = [1, 1, 1]} : vector<2x64x16xf32> to vector<2x64x8xf32>
    %51 = vector.extract_strided_slice %49 {offsets = [0, 0, 0], sizes = [2, 64, 8], strides = [1, 1, 1]} : vector<2x64x16xf32> to vector<2x64x8xf32>
    %52 = tpu.concatenate %50, %51 in 2 : vector<2x64x8xf32>, vector<2x64x8xf32> -> vector<2x64x16xf32>
    %53 = arith.addf %48, %52 : vector<2x64x16xf32>
    %54 = vector.shape_cast %53 : vector<2x64x16xf32> to vector<128x16xf32>
    %c0_27 = arith.constant 0 : index
    %c0_28 = arith.constant 0 : index
    %55 = vector.load %arg6[%c0_27, %c0_28] : memref<16x8xf32, #tpu.memory_space<vmem>>, vector<16x8xf32>
    %cst_29 = arith.constant dense<0.000000e+00> : vector<128x8xf32>
    %56 = tpu.matmul %54, %55, %cst_29 {dimension_numbers = #tpu.dot_dimension_numbers<[1], [0], [0], [1], [0, 0, 1, 1], [], []>} : vector<128x16xf32>, vector<16x8xf32>, vector<128x8xf32> -> vector<128x8xf32>
    %57 = vector.extract_strided_slice %56 {offsets = [0, 0], sizes = [128, 4], strides = [1, 1]} : vector<128x8xf32> to vector<128x4xf32>
    %58 = vector.shape_cast %57 : vector<128x4xf32> to vector<2x64x4xf32>
    %59 = vector.extract_strided_slice %56 {offsets = [0, 4], sizes = [128, 4], strides = [1, 1]} : vector<128x8xf32> to vector<128x4xf32>
    %60 = vector.shape_cast %59 : vector<128x4xf32> to vector<2x64x4xf32>
    %c0_30 = arith.constant 0 : index
    %c16 = arith.constant 16 : index
    %c0_31 = arith.constant 0 : index
    %61 = vector.load %arg10[%c0_30, %c16, %c0_31] : memref<2x89x4xf32, #tpu.memory_space<vmem>>, vector<2x64x4xf32>
    tpu.vector_store %arg10[%c0_30, %c16, %c0_31], %58 {strides = array<i32>} : memref<2x89x4xf32, #tpu.memory_space<vmem>>, vector<2x64x4xf32>,
    %62 = tpu.iota {dimensions = array<i32: 1>} : vector<1x64x4xi32>
    %c8_i32 = arith.constant 8 : i32
    %c0_i32 = arith.constant 0 : i32
    %63 = arith.cmpi eq, %c8_i32, %c0_i32 : i32
    %c1_i32 = arith.constant 1 : i32
    %64 = arith.select %63, %c1_i32, %c8_i32 : i32
    %65 = vector.broadcast %64 : i32 to vector<1x64x4xi32>
    %66 = arith.remsi %62, %65 : vector<1x64x4xi32>
    %c0_i32_32 = arith.constant 0 : i32
    %67 = vector.broadcast %c0_i32_32 : i32 to vector<1x64x4xi32>
    %68 = arith.cmpi ne, %66, %67 : vector<1x64x4xi32>
    %c0_i32_33 = arith.constant 0 : i32
    %69 = vector.broadcast %c0_i32_33 : i32 to vector<1x64x4xi32>
    %70 = arith.cmpi slt, %66, %69 : vector<1x64x4xi32>
    %c0_i32_34 = arith.constant 0 : i32
    %71 = arith.cmpi slt, %64, %c0_i32_34 : i32
    %72 = vector.broadcast %71 : i1 to vector<1x64x4xi1>
    %73 = vector.broadcast %72 : vector<1x64x4xi1> to vector<1x64x4xi1>
    %74 = arith.xori %70, %73 : vector<1x64x4xi1>
    %75 = arith.andi %74, %68 : vector<1x64x4xi1>
    %76 = vector.broadcast %64 : i32 to vector<1x64x4xi32>
    %77 = arith.addi %66, %76 : vector<1x64x4xi32>
    %78 = arith.select %75, %77, %66 : vector<1x64x4xi1>, vector<1x64x4xi32>
    %c8_i32_35 = arith.constant 8 : i32
    %79 = vector.broadcast %c8_i32_35 : i32 to vector<1x64x4xi32>
    %80 = arith.cmpi sge, %62, %79 : vector<1x64x4xi32>
    %c56_i32 = arith.constant 56 : i32
    %81 = vector.broadcast %c56_i32 : i32 to vector<1x64x4xi32>
    %82 = arith.cmpi slt, %62, %81 : vector<1x64x4xi32>
    %c0_i32_36 = arith.constant 0 : i32
    %83 = vector.broadcast %c0_i32_36 : i32 to vector<1x64x4xi32>
    %84 = arith.cmpi ne, %78, %83 : vector<1x64x4xi32>
    %c7_i32 = arith.constant 7 : i32
    %85 = vector.broadcast %c7_i32 : i32 to vector<1x64x4xi32>
    %86 = arith.cmpi ne, %78, %85 : vector<1x64x4xi32>
    %c0_37 = arith.constant 0 : index
    %c7 = arith.constant 7 : index
    %c0_38 = arith.constant 0 : index
    %87 = vector.load %arg10[%c0_37, %c7, %c0_38] : memref<2x89x4xf32, #tpu.memory_space<vmem>>, vector<2x64x4xf32>
    %88 = arith.andi %80, %84 : vector<1x64x4xi1>
    %cst_39 = arith.constant 0.000000e+00 : f32
    %89 = vector.shape_cast %88 : vector<1x64x4xi1> to vector<1x64x4xi1>
    %90 = vector.broadcast %89 : vector<1x64x4xi1> to vector<2x64x4xi1>
    %91 = vector.broadcast %cst_39 : f32 to vector<2x64x4xf32>
    %92 = arith.select %90, %87, %91 : vector<2x64x4xi1>, vector<2x64x4xf32>
    %c0_40 = arith.constant 0 : index
    %c8 = arith.constant 8 : index
    %c0_41 = arith.constant 0 : index
    %93 = vector.load %arg10[%c0_40, %c8, %c0_41] : memref<2x89x4xf32, #tpu.memory_space<vmem>>, vector<2x64x4xf32>
    %cst_42 = arith.constant 0.000000e+00 : f32
    %94 = vector.shape_cast %80 : vector<1x64x4xi1> to vector<1x64x4xi1>
    %95 = vector.broadcast %94 : vector<1x64x4xi1> to vector<2x64x4xi1>
    %96 = vector.broadcast %cst_42 : f32 to vector<2x64x4xf32>
    %97 = arith.select %95, %93, %96 : vector<2x64x4xi1>, vector<2x64x4xf32>
    %c0_43 = arith.constant 0 : index
    %c9 = arith.constant 9 : index
    %c0_44 = arith.constant 0 : index
    %98 = vector.load %arg10[%c0_43, %c9, %c0_44] : memref<2x89x4xf32, #tpu.memory_space<vmem>>, vector<2x64x4xf32>
    %99 = arith.andi %80, %86 : vector<1x64x4xi1>
    %cst_45 = arith.constant 0.000000e+00 : f32
    %100 = vector.shape_cast %99 : vector<1x64x4xi1> to vector<1x64x4xi1>
    %101 = vector.broadcast %100 : vector<1x64x4xi1> to vector<2x64x4xi1>
    %102 = vector.broadcast %cst_45 : f32 to vector<2x64x4xf32>
    %103 = arith.select %101, %98, %102 : vector<2x64x4xi1>, vector<2x64x4xf32>
    %c0_46 = arith.constant 0 : index
    %c15 = arith.constant 15 : index
    %c0_47 = arith.constant 0 : index
    %104 = vector.load %arg10[%c0_46, %c15, %c0_47] : memref<2x89x4xf32, #tpu.memory_space<vmem>>, vector<2x64x4xf32>
    %cst_48 = arith.constant 0.000000e+00 : f32
    %105 = vector.shape_cast %84 : vector<1x64x4xi1> to vector<1x64x4xi1>
    %106 = vector.broadcast %105 : vector<1x64x4xi1> to vector<2x64x4xi1>
    %107 = vector.broadcast %cst_48 : f32 to vector<2x64x4xf32>
    %108 = arith.select %106, %104, %107 : vector<2x64x4xi1>, vector<2x64x4xf32>
    %c0_49 = arith.constant 0 : index
    %c16_50 = arith.constant 16 : index
    %c0_51 = arith.constant 0 : index
    %109 = vector.load %arg10[%c0_49, %c16_50, %c0_51] : memref<2x89x4xf32, #tpu.memory_space<vmem>>, vector<2x64x4xf32>
    %c0_52 = arith.constant 0 : index
    %c17 = arith.constant 17 : index
    %c0_53 = arith.constant 0 : index
    %110 = vector.load %arg10[%c0_52, %c17, %c0_53] : memref<2x89x4xf32, #tpu.memory_space<vmem>>, vector<2x64x4xf32>
    %cst_54 = arith.constant 0.000000e+00 : f32
    %111 = vector.shape_cast %86 : vector<1x64x4xi1> to vector<1x64x4xi1>
    %112 = vector.broadcast %111 : vector<1x64x4xi1> to vector<2x64x4xi1>
    %113 = vector.broadcast %cst_54 : f32 to vector<2x64x4xf32>
    %114 = arith.select %112, %110, %113 : vector<2x64x4xi1>, vector<2x64x4xf32>
    %c0_55 = arith.constant 0 : index
    %c23 = arith.constant 23 : index
    %c0_56 = arith.constant 0 : index
    %115 = vector.load %arg10[%c0_55, %c23, %c0_56] : memref<2x89x4xf32, #tpu.memory_space<vmem>>, vector<2x64x4xf32>
    %116 = arith.andi %82, %84 : vector<1x64x4xi1>
    %cst_57 = arith.constant 0.000000e+00 : f32
    %117 = vector.shape_cast %116 : vector<1x64x4xi1> to vector<1x64x4xi1>
    %118 = vector.broadcast %117 : vector<1x64x4xi1> to vector<2x64x4xi1>
    %119 = vector.broadcast %cst_57 : f32 to vector<2x64x4xf32>
    %120 = arith.select %118, %115, %119 : vector<2x64x4xi1>, vector<2x64x4xf32>
    %c0_58 = arith.constant 0 : index
    %c24 = arith.constant 24 : index
    %c0_59 = arith.constant 0 : index
    %121 = vector.load %arg10[%c0_58, %c24, %c0_59] : memref<2x89x4xf32, #tpu.memory_space<vmem>>, vector<2x64x4xf32>
    %cst_60 = arith.constant 0.000000e+00 : f32
    %122 = vector.shape_cast %82 : vector<1x64x4xi1> to vector<1x64x4xi1>
    %123 = vector.broadcast %122 : vector<1x64x4xi1> to vector<2x64x4xi1>
    %124 = vector.broadcast %cst_60 : f32 to vector<2x64x4xf32>
    %125 = arith.select %123, %121, %124 : vector<2x64x4xi1>, vector<2x64x4xf32>
    %c0_61 = arith.constant 0 : index
    %c25 = arith.constant 25 : index
    %c0_62 = arith.constant 0 : index
    %126 = vector.load %arg10[%c0_61, %c25, %c0_62] : memref<2x89x4xf32, #tpu.memory_space<vmem>>, vector<2x64x4xf32>
    %127 = arith.andi %82, %86 : vector<1x64x4xi1>
    %cst_63 = arith.constant 0.000000e+00 : f32
    %128 = vector.shape_cast %127 : vector<1x64x4xi1> to vector<1x64x4xi1>
    %129 = vector.broadcast %128 : vector<1x64x4xi1> to vector<2x64x4xi1>
    %130 = vector.broadcast %cst_63 : f32 to vector<2x64x4xf32>
    %131 = arith.select %129, %126, %130 : vector<2x64x4xi1>, vector<2x64x4xf32>
    %132 = tpu.concatenate %92, %97, %103, %108, %109, %114, %120, %125, %131, %60 in 2 : vector<2x64x4xf32>, vector<2x64x4xf32>, vector<2x64x4xf32>, vector<2x64x4xf32>, vector<2x64x4xf32>, vector<2x64x4xf32>, vector<2x64x4xf32>, vector<2x64x4xf32>, vector<2x64x4xf32>, vector<2x64x4xf32> -> vector<2x64x40xf32>
    %133 = vector.shape_cast %132 : vector<2x64x40xf32> to vector<128x40xf32>
    %c0_64 = arith.constant 0 : index
    %c0_65 = arith.constant 0 : index
    %134 = vector.load %arg7[%c0_64, %c0_65] : memref<40x32xf32, #tpu.memory_space<vmem>>, vector<40x32xf32>
    %cst_66 = arith.constant dense<0.000000e+00> : vector<128x32xf32>
    %135 = tpu.matmul %133, %134, %cst_66 {dimension_numbers = #tpu.dot_dimension_numbers<[1], [0], [0], [1], [0, 0, 1, 1], [], []>} : vector<128x40xf32>, vector<40x32xf32>, vector<128x32xf32> -> vector<128x32xf32>
    %c0_67 = arith.constant 0 : index
    %c0_68 = arith.constant 0 : index
    %136 = vector.load %arg8[%c0_67, %c0_68] : memref<1x32xf32, #tpu.memory_space<vmem>>, vector<1x32xf32>
    %137 = vector.broadcast %136 : vector<1x32xf32> to vector<128x32xf32>
    %138 = arith.addf %135, %137 : vector<128x32xf32>
    %139 = vector.shape_cast %138 : vector<128x32xf32> to vector<2x64x32xf32>
    %cst_69 = arith.constant dense<0.000000e+00> : vector<2x32xf32>
    %140 = vector.multi_reduction <add>, %139, %cst_69 [1] : vector<2x64x32xf32> to vector<2x32xf32>
    %cst_70 = arith.constant 6.400000e+01 : f32
    %141 = vector.broadcast %cst_70 : f32 to vector<2x32xf32>
    %142 = arith.divf %140, %141 : vector<2x32xf32>
    %cst_71 = arith.constant dense<0xFF800000> : vector<2xf32>
    %143 = vector.multi_reduction <maximumf>, %142, %cst_71 [1] : vector<2x32xf32> to vector<2xf32>
    %144 = vector.shape_cast %143 : vector<2xf32> to vector<2x1xf32>
    %145 = vector.broadcast %144 : vector<2x1xf32> to vector<2x32xf32>
    %146 = arith.subf %142, %145 : vector<2x32xf32>
    %147 = math.exp %146 : vector<2x32xf32>
    %cst_72 = arith.constant dense<0.000000e+00> : vector<2xf32>
    %148 = vector.multi_reduction <add>, %147, %cst_72 [1] : vector<2x32xf32> to vector<2xf32>
    %149 = vector.shape_cast %148 : vector<2xf32> to vector<2x1xf32>
    %150 = vector.broadcast %149 : vector<2x1xf32> to vector<2x32xf32>
    %151 = arith.divf %147, %150 : vector<2x32xf32>
    %152 = vector.extract_strided_slice %139 {offsets = [0, 0, 0], sizes = [2, 64, 16], strides = [1, 1, 1]} : vector<2x64x32xf32> to vector<2x64x16xf32>
    %153 = vector.extract_strided_slice %151 {offsets = [0, 0], sizes = [2, 16], strides = [1, 1]} : vector<2x32xf32> to vector<2x16xf32>
    %154 = vector.shape_cast %153 : vector<2x16xf32> to vector<2x1x16xf32>
    %155 = vector.broadcast %154 : vector<2x1x16xf32> to vector<2x64x16xf32>
    %156 = arith.mulf %152, %155 : vector<2x64x16xf32>
    %157 = vector.extract_strided_slice %139 {offsets = [0, 0, 16], sizes = [2, 64, 16], strides = [1, 1, 1]} : vector<2x64x32xf32> to vector<2x64x16xf32>
    %158 = vector.extract_strided_slice %151 {offsets = [0, 16], sizes = [2, 16], strides = [1, 1]} : vector<2x32xf32> to vector<2x16xf32>
    %159 = vector.shape_cast %158 : vector<2x16xf32> to vector<2x1x16xf32>
    %160 = vector.broadcast %159 : vector<2x1x16xf32> to vector<2x64x16xf32>
    %161 = arith.mulf %157, %160 : vector<2x64x16xf32>
    %162 = arith.addf %156, %161 : vector<2x64x16xf32>
    %163 = arith.addf %2, %162 : vector<2x64x16xf32>
    %c0_73 = arith.constant 0 : index
    %c1_74 = arith.constant 1 : index
    %c0_75 = arith.constant 0 : index
    %164 = vector.load %arg9[%c0_73, %c1_74, %c0_75] : memref<2x65x16xf32, #tpu.memory_space<vmem>>, vector<2x64x16xf32>
    tpu.vector_store %arg9[%c0_73, %c1_74, %c0_75], %163 {strides = array<i32>} : memref<2x65x16xf32, #tpu.memory_space<vmem>>, vector<2x64x16xf32>,
    return
  }
  func.func @transform_0(%arg0: i32) -> (i32, i32, i32) {
    %c0_i32 = arith.constant 0 : i32
    %c0_i32_0 = arith.constant 0 : i32
    %c0_i32_1 = arith.constant 0 : i32
    return %arg0, %c0_i32, %c0_i32_0 : i32, i32, i32
  }
  func.func @transform_1(%arg0: i32) -> (i32, i32) {
    %c0_i32 = arith.constant 0 : i32
    %c0_i32_0 = arith.constant 0 : i32
    %c0_i32_1 = arith.constant 0 : i32
    return %c0_i32, %c0_i32_0 : i32, i32
  }
  func.func @transform_2(%arg0: i32) -> (i32, i32) {
    %c0_i32 = arith.constant 0 : i32
    %c0_i32_0 = arith.constant 0 : i32
    %c0_i32_1 = arith.constant 0 : i32
    return %c0_i32, %c0_i32_0 : i32, i32
  }
  func.func @transform_3(%arg0: i32) -> (i32, i32) {
    %c0_i32 = arith.constant 0 : i32
    %c0_i32_0 = arith.constant 0 : i32
    %c0_i32_1 = arith.constant 0 : i32
    return %c0_i32, %c0_i32_0 : i32, i32
  }
  func.func @transform_4(%arg0: i32) -> (i32, i32) {
    %c0_i32 = arith.constant 0 : i32
    %c0_i32_0 = arith.constant 0 : i32
    %c0_i32_1 = arith.constant 0 : i32
    return %c0_i32, %c0_i32_0 : i32, i32
  }
  func.func @transform_5(%arg0: i32) -> (i32, i32) {
    %c0_i32 = arith.constant 0 : i32
    %c0_i32_0 = arith.constant 0 : i32
    %c0_i32_1 = arith.constant 0 : i32
    return %c0_i32, %c0_i32_0 : i32, i32
  }
  func.func @transform_6(%arg0: i32) -> (i32, i32) {
    %c0_i32 = arith.constant 0 : i32
    %c0_i32_0 = arith.constant 0 : i32
    %c0_i32_1 = arith.constant 0 : i32
    return %c0_i32, %c0_i32_0 : i32, i32
  }
  func.func @transform_7(%arg0: i32) -> (i32, i32) {
    %c0_i32 = arith.constant 0 : i32
    %c0_i32_0 = arith.constant 0 : i32
    %c0_i32_1 = arith.constant 0 : i32
    return %c0_i32, %c0_i32_0 : i32, i32
  }
  func.func @transform_8(%arg0: i32) -> (i32, i32, i32) {
    %c0_i32 = arith.constant 0 : i32
    %c0_i32_0 = arith.constant 0 : i32
    %c0_i32_1 = arith.constant 0 : i32
    return %arg0, %c0_i32, %c0_i32_0 : i32, i32, i32
  }
}

</mosaic_0001>

<bundles_post_ra>
// kernel: tpu_custom_call.1
= control target key start
LH: loop header
LB: loop body
LE: loop exit
PB: predicated region body
PF: predicated region fallthrough
CT: control target
= control target key end

     0   :  { %vm4144_vm0 = vcmask 130048   ;;  %vm31_vm1 = vcmask 122880   ;;  %vm4143_vm2 = vcmask 1041409   ;;  %vm227_vm3 = vcmask 1043456   ;;  %s2389_s28 = smov 4   ;;  %s2390_s30 = smov 8   ;;  %s4132_s3 = inlined_call_operand.vmem [shape: f32[16,4], index: 3, kind: input, shape index: {}]   ;;  %s4133_s0 = inlined_call_operand.vmem [shape: f32[2,65,16], index: 0, kind: input, shape index: {}]   ;;  %s4134_s1 = inlined_call_operand.vmem [shape: f32[1,16], index: 1, kind: input, shape index: {}]   ;;  %s4135_s8 = inlined_call_operand.vmem [shape: f32[2,65,16], index: 8, kind: output, shape index: {}]   ;;  %s4136_s4 = inlined_call_operand.vmem [shape: f32[4,16], index: 4, kind: input, shape index: {}]   ;;  %s4137_s2 = inlined_call_operand.vmem [shape: f32[1,16], index: 2, kind: input, shape index: {}]   ;;  %s4138_s5 = inlined_call_operand.vmem [shape: f32[16,8], index: 5, kind: input, shape index: {}]   ;;  %s4139_s6 = inlined_call_operand.vmem [shape: f32[40,32], index: 6, kind: input, shape index: {}]   ;;  %s4140_s7 = inlined_call_operand.vmem [shape: f32[1,32], index: 7, kind: input, shape index: {}]  }
   0x1   :  { %v154_v0 = vld [vmem:[%s4132_s3 + $0x8] sm:$0xff]  ;;  %v153_v1 = vld [vmem:[%s4132_s3] sm:$0xff]  ;;  %v2463_v4 = vld [vmem:[%s4133_s0 + $0x11] sm:$0xff]  ;;  %vm4161_vm4 = vcmask 31744   ;;  %s2391_s9 = smov 28   ;;  %s2392_s10 = smov 24  }
   0x2   :  { %v2453_v2 = vld [vmem:[%s4133_s0 + $0x1] sm:$0xff]  ;;  %176 = vmatpush.msra.mxu0 %v154_v0  ;;  %202 = vmatpush.msra.mxu1 %v154_v0  ;;  %v2458_v3 = vld [vmem:[%s4133_s0 + $0x9] sm:$0xff]  ;;  %v2468_v5 = vld [vmem:[%s4133_s0 + $0x19] sm:$0xff]  ;;  %v56_v10 = vsel %vm4144_vm0, %v2463_v4, 0.0  ;;  %v97_v40 = vmul.f32 %v2463_v4, %v2463_v4  ;;  %s2395_s3 = smov 12   ;;  %s2396_s17 = smov 20  }
   0x3   :  { %v53_v6 = vsel %vm4144_vm0, %v2453_v2, 0.0  ;;  %v2475_v7 = vld [vmem:[%s4133_s0 + $0x21] sm:$0xff]  ;;  %v2480_v8 = vld [vmem:[%s4133_s0 + $0x29] sm:$0xff]  ;;  %v54_v9 = vsel %vm4144_vm0, %v2458_v3, 0.0  ;;  %v2489_v11 = vld [vmem:[%s4133_s0 + $0x31] sm:$0xff]  ;;  %v58_v18 = vsel %vm4144_vm0, %v2468_v5, 0.0  ;;  %v95_v27 = vmul.f32 %v2453_v2, %v2453_v2 }
   0x4   :  { %177 = vmatpush.msra.mxu0 %v153_v1  ;;  %v2494_v12 = vld [vmem:[%s4133_s0 + $0x49] sm:$0xff]  ;;  %v2499_v13 = vld [vmem:[%s4133_s0 + $0x51] sm:$0xff]  ;;  %v55_v14 = vadd.f32 %v54_v9, %v53_v6  ;;  %203 = vmatpush.msra.mxu1 %v153_v1  ;;  %v2504_v15 = vld [vmem:[%s4133_s0 + $0x39] sm:$0xff]  ;;  %v60_v29 = vsel %vm4144_vm0, %v2475_v7, 0.0  ;;  %v62_v30 = vsel %vm4144_vm0, %v2480_v8, 0.0  ;;  %v96_v32 = vmul.f32 %v2458_v3, %v2458_v3 }
   0x5   :  { %v2509_v16 = vld [vmem:[%s4133_s0 + $0x59] sm:$0xff]  ;;  %v2514_v17 = vld [vmem:[%s4133_s0 + $0x61] sm:$0xff]  ;;  %v74_v19 = vsel %vm4144_vm0, %v2494_v12, 0.0  ;;  %v75_v20 = vsel %vm4144_vm0, %v2499_v13, 0.0  ;;  %v2525_v21 = vld [vmem:[%s4133_s0 + $0x69] sm:$0xff]  ;;  %v64_v34 = vsel %vm4144_vm0, %v2489_v11, 0.0  ;;  %v98_v44 = vmul.f32 %v2468_v5, %v2468_v5 }
   0x6   :  { %v2530_v22 = vld [vmem:[%s4133_s0 + $0x71] sm:$0xff]  ;;  %v2535_v23 = vld [vmem:[%s4133_s0 + $0x79] sm:$0xff]  ;;  %v57_v24 = vadd.f32 %v56_v10, %v55_v14  ;;  %v76_v25 = vadd.f32 %v75_v20, %v74_v19  ;;  %v77_v26 = vsel %vm4144_vm0, %v2509_v16, 0.0  ;;  %v2544_v28 = vld [vmem:[%s4133_s0 + $0x81] sm:$0xff]  ;;  %v79_v31 = vsel %vm4144_vm0, %v2514_v17, 0.0 }
   0x7   :  { %v66_v35 = vsel %vm4144_vm0, %v2504_v15, 0.0  ;;  %v81_v37 = vsel %vm4144_vm0, %v2525_v21, 0.0  ;;  %v83_v38 = vsel %vm4144_vm0, %v2530_v22, 0.0  ;;  %v85_v39 = vsel %vm4144_vm0, %v2535_v23, 0.0 }
   0x8   :  { %v59_v33 = vadd.f32 %v58_v18, %v57_v24  ;;  %v78_v36 = vadd.f32 %v77_v26, %v76_v25  ;;  %v87_v43 = vsel %vm4144_vm0, %v2544_v28, 0.0  ;;  %v99_v45 = vmul.f32 %v2475_v7, %v2475_v7  ;;  %v29_v24 = vld [vmem:[%s4133_s0] sm:$0x1] }
   0x9   :  { %v100_v46 = vmul.f32 %v2480_v8, %v2480_v8  ;;  %v103_v47 = vmul.f32 %v2494_v12, %v2494_v12  ;;  %v104_v48 = vmul.f32 %v2499_v13, %v2499_v13  ;;  %v101_v51 = vmul.f32 %v2489_v11, %v2489_v11  ;;  %32 = vst.msk [vmem:[%s4135_s8] sm:$0x1] %vm31_vm1, %v29_v24 }
   0xa   :  { %v61_v41 = vadd.f32 %v60_v29, %v59_v33  ;;  %v80_v42 = vadd.f32 %v79_v31, %v78_v36  ;;  %v111_v52 = vsel %vm4144_vm0, %v95_v27, 0.0  ;;  %v105_v53 = vmul.f32 %v2509_v16, %v2509_v16  ;;  %v30_v31 = vld [vmem:[%s4133_s0 + $0x48] sm:$0x1] }
   0xb   :  { %v106_v54 = vmul.f32 %v2514_v17, %v2514_v17  ;;  %v112_v55 = vsel %vm4144_vm0, %v96_v32, 0.0  ;;  %v114_v56 = vsel %vm4144_vm0, %v97_v40, 0.0  ;;  %v102_v59 = vmul.f32 %v2504_v15, %v2504_v15  ;;  %33 = vst.msk [vmem:[%s4135_s8 + $0x48] sm:$0x1] %vm31_vm1, %v30_v31 }
   0xc   :  { %v63_v49 = vadd.f32 %v62_v30, %v61_v41  ;;  %v82_v50 = vadd.f32 %v81_v37, %v80_v42  ;;  %v113_v60 = vadd.f32 %v112_v55, %v111_v52  ;;  %v107_v61 = vmul.f32 %v2525_v21, %v2525_v21  ;;  %v2605_v30 = vld [vmem:[%s4134_s1] sm:$0x1] }
   0xd   :  { %v116_v62 = vsel %vm4144_vm0, %v98_v44, 0.0  ;;  %v132_v63 = vsel %vm4144_vm0, %v103_v47, 0.0  ;;  %v133_v0 = vsel %vm4144_vm0, %v104_v48, 0.0  ;;  %v108_v14 = vmul.f32 %v2530_v22, %v2530_v22 }
   0xe   :  { %v65_v57 = vadd.f32 %v64_v34, %v63_v49  ;;  %v84_v58 = vadd.f32 %v83_v38, %v82_v50  ;;  %v115_v9 = vadd.f32 %v114_v56, %v113_v60  ;;  %v134_v10 = vadd.f32 %v133_v0, %v132_v63 }
   0xf   :  { %v118_v18 = vsel %vm4144_vm0, %v99_v45, 0.0  ;;  %v135_v19 = vsel %vm4144_vm0, %v105_v53, 0.0  ;;  %v137_v20 = vsel %vm4144_vm0, %v106_v54, 0.0  ;;  %v109_v32 = vmul.f32 %v2535_v23, %v2535_v23 }
  0x10   :  { %v67_v1 = vadd.f32 %v66_v35, %v65_v57  ;;  %v86_v6 = vadd.f32 %v85_v39, %v84_v58  ;;  %v117_v27 = vadd.f32 %v116_v62, %v115_v9  ;;  %v136_v29 = vadd.f32 %v135_v19, %v134_v10 }
  0x11   :  { %v120_v33 = vsel %vm4144_vm0, %v100_v46, 0.0  ;;  %v139_v34 = vsel %vm4144_vm0, %v107_v61, 0.0  ;;  %v110_v39 = vmul.f32 %v2544_v28, %v2544_v28  ;;  %v122_v40 = vsel %vm4144_vm0, %v101_v51, 0.0 }
  0x12   :  { %v68_v25 = vrot.slane %v67_v1, 4  ;;  %v88_v26 = vadd.f32 %v87_v43, %v86_v6  ;;  %v119_v37 = vadd.f32 %v118_v18, %v117_v27  ;;  %v138_v38 = vadd.f32 %v137_v20, %v136_v29  ;;  %v155_v27 = vld [vmem:[%s4136_s4] sm:$0xf]  ;;  %s2388_s4 = smov 32  }
  0x13   :  { %v141_v41 = vsel %vm4144_vm0, %v108_v14, 0.0  ;;  %v327_v42 = vsel %vm31_vm1, %v2605_v30, 0.0  ;;  %v124_v47 = vsel %vm4144_vm0, %v102_v59, 0.0  ;;  %v143_v48 = vsel %vm4144_vm0, %v109_v32, 0.0  ;;  %2277 = vmatpush.msk.msrb.mxu1 %vm227_vm3, %v155_v27  ;;  %2279 = vmatpush.msk.msra.mxu3 %vm227_vm3, %v155_v27 }
  0x14   :  { %v69_v35 = vadd.f32 %v68_v25, %v67_v1  ;;  %v89_v36 = vrot.slane %v88_v26, 4  ;;  %v121_v45 = vadd.f32 %v120_v33, %v119_v37  ;;  %v140_v46 = vadd.f32 %v139_v34, %v138_v38  ;;  %328 = vadd.xlane.f32.xlu0 %v327_v42 }
  0x15   :  { %v145_v53 = vsel %vm4144_vm0, %v110_v39, 0.0 }
  0x16   :  { %v70_v43 = vrot.slane %v69_v35, 2  ;;  %v90_v44 = vadd.f32 %v89_v36, %v88_v26  ;;  %v123_v51 = vadd.f32 %v122_v40, %v121_v45  ;;  %v142_v52 = vadd.f32 %v141_v41, %v140_v46 }
  0x18   :  { %v71_v49 = vadd.f32 %v70_v43, %v69_v35  ;;  %v91_v50 = vrot.slane %v90_v44, 2  ;;  %v125_v56 = vadd.f32 %v124_v47, %v123_v51  ;;  %v144_v57 = vadd.f32 %v143_v48, %v142_v52 }
  0x19   :  { %v4141_v52 = vmov 0.0  }
  0x1a   :  { %v72_v54 = vrot.slane %v71_v49, 1  ;;  %v92_v55 = vadd.f32 %v91_v50, %v90_v44  ;;  %v126_v61 = vrot.slane %v125_v56, 4  ;;  %v146_v62 = vadd.f32 %v145_v53, %v144_v57  ;;  %2335 = vrot.lane.b32.xlu2 %v4141_v52, %s2389_s28  ;;  %2350 = vrot.lane.b32.xlu1 %v4141_v52, %s2391_s9 }
  0x1c   :  { %v73_v58 = vadd.f32 %v72_v54, %v71_v49  ;;  %v93_v60 = vrot.slane %v92_v55, 1  ;;  %v127_v0 = vadd.f32 %v126_v61, %v125_v56  ;;  %v147_v59 = vrot.slane %v146_v62, 4 }
  0x1e   :  { %v94_v63 = vadd.f32 %v93_v60, %v92_v55  ;;  %v128_v6 = vrot.slane %v127_v0, 2  ;;  %v148_v9 = vadd.f32 %v147_v59, %v146_v62  ;;  %v275_v62 = vperm.slane %v2605_v30, 0 }
  0x20   :  { %v159_v1 = vsel %vm4143_vm2, %v94_v63, %v73_v58  ;;  %v129_v10 = vadd.f32 %v128_v6, %v127_v0  ;;  %v149_v14 = vrot.slane %v148_v9, 2  ;;  %v2354_v6 = vld [vmem:[%s4137_s2] ss:$0 sm:$0xff]  ;;  %s2393_s2 = smov 120  }
  0x21   :  { %2275 = vmatmul.msk.f32.vlgmr.msra.gmra.mxu0 %vm4144_vm0, %v159_v1 }
  0x22   :  { %v130_v18 = vrot.slane %v129_v10, 1  ;;  %v150_v19 = vadd.f32 %v149_v14, %v148_v9  ;;  %2340 = vrot.lane.b32.xlu2 %v4141_v52, %s2390_s30 }
  0x24   :  { %v131_v20 = vadd.f32 %v130_v18, %v129_v10  ;;  %v151_v24 = vrot.slane %v150_v19, 1 }
  0x26   :  { %v152_v25 = vadd.f32 %v151_v24, %v150_v19 }
  0x28   :  { %v185_v26 = vsel %vm4143_vm2, %v152_v25, %v131_v20  ;;  %1675 = vrot.lane.b32.xlu0 %v4141_v52, %s2388_s4 }
  0x29   :  { %2276 = vmatmul.msk.f32.vlgmr.msra.gmra.mxu1 %vm4144_vm0, %v185_v26 }
  0x2a   :  { %2345 = vrot.lane.b32.xlu2 %v4141_v52, %s2392_s10 }
  0x87   :  { %v329_v32 = vpop.xlane.xlu0 %328 }
  0x88   :  { %v330_v33 = vrot.slane %v329_v32, 4 }
  0x8a   :  { %v331_v34 = vadd.f32 %v330_v33, %v329_v32 }
  0x8c   :  { %v332_v37 = vrot.slane %v331_v34, 2 }
  0x8e   :  { %v333_v39 = vadd.f32 %v332_v37, %v331_v34 }
  0x90   :  { %v334_v41 = vrot.slane %v333_v39, 1 }
  0x92   :  { %v335_v43 = vadd.f32 %v334_v41, %v333_v39 }
  0x94   :  { %2320 = vpush %v335_v43 }
  0x9e   :  { %v179_v29 = vpop.f32.mrf.mxu0 }
  0x9f   :  { %v182_v31 = vmul.f32 0.00390625, %v179_v29 }
  0xa1   :  { %2278 = vmatmul.msk.f32.vlgmr.msrb.gmra.mxu1 %vm4161_vm4, %v182_v31  ;;  %v209_v35 = vmul.f32 %v182_v31, %v182_v31 }
  0xa6   :  { %v205_v36 = vpop.f32.mrf.mxu1 }
  0xa7   :  { %v208_v38 = vmul.f32 0.00390625, %v205_v36 }
  0xa9   :  { %v210_v40 = vsub.f32 %v208_v38, %v209_v35 }
  0xab   :  { %v211_v42 = vmax.f32 %v210_v40, 0.0 }
  0xad   :  { %v212_v44 = vadd.f32 1e-05, %v211_v42 }
  0xaf   :  { %2356 = vrsqrt.f32 %v212_v44  ;;  %vm219_vm6 = vweird.f32 %v212_v44 }
  0xb5   :  { %v2357_v45 = vpop.eup %2356 }
  0xb6   :  { %v214_v46 = vmul.f32 %v2357_v45, %v212_v44  ;;  %vm220_vm5 = vweird.f32 %v2357_v45 }
  0xb7   :  { %vm221_vm7 = vmor %vm219_vm6, %vm220_vm5 }
  0xb8   :  { %v215_v47 = vmul.f32 %v2357_v45, %v214_v46 }
  0xba   :  { %v216_v48 = vmul.f32 0.5, %v215_v47 }
  0xbc   :  { %v217_v49 = vsub.f32 1.5, %v216_v48 }
  0xbe   :  { %v218_v50 = vmul.f32 %v2357_v45, %v217_v49 }
  0xc0   :  { %v222_v51 = vsel %vm221_vm7, %v2357_v45, %v218_v50 }
  0xc1   :  { %2280 = vmatmul.msk.f32.vlgmr.msra.gmra.mxu3 %vm4161_vm4, %v222_v51 }
  0xc5   :  { %s2321_s29 = spop %2320 }
  0xc6   :  { %v337_v53 = vstv %s2321_s29 }
  0xc7   :  { %2358 = vrcp.f32 %v337_v53  ;;  %vm343_vm8 = vweird.f32 %v337_v53  ;;  %v349_v58 = vand.u32 2147483648, %v337_v53  ;;  %v347_v61 = vand.u32 2147483647, %v337_v53 }
  0xc9   :  { %v350_v63 = vor.u32 1.1754944e-38, %v349_v58  ;;  %vm348_vm11 = vcmp.eq.f32.partialorder %v347_v61, 8.507059e+37 }
  0xcd   :  { %v2359_v54 = vpop.eup %2358 }
  0xce   :  { %v339_v55 = vmul.f32 %v2359_v54, %v337_v53  ;;  %vm344_vm9 = vweird.f32 %v2359_v54 }
  0xcf   :  { %vm345_vm10 = vmor %vm343_vm8, %vm344_vm9 }
  0xd0   :  { %v340_v56 = vsub.f32 1.0, %v339_v55 }
  0xd2   :  { %v341_v57 = vmul.f32 %v2359_v54, %v340_v56 }
  0xd4   :  { %v342_v60 = vadd.f32 %v2359_v54, %v341_v57 }
  0xd6   :  { %v346_v0 = vsel %vm345_vm10, %v2359_v54, %v342_v60 }
  0xd7   :  { %v351_v10 = vsel %vm348_vm11, %v350_v63, %v346_v0 }
  0xd8   :  { %v352_v19 = vmul.f32 %v351_v10, %v2605_v30 }
  0xda   :  { %v2656_v31 = vperm.slane %v352_v19, 0 }
 0x11e   :  { %v248_v9 = vpop.f32.mrf.mxu1 }
 0x144   :  { %v271_v59 = vpop.f32.mrf.mxu3 }
 0x145   :  { %v277_v1 = vmul.f32 %v275_v62, %v271_v59 }
 0x147   :  { %v278_v14 = vmul.f32 %v277_v1, %v248_v9  ;;  %v285_v18 = vperm.slane %v277_v1, 0 }
 0x149   :  { %v282_v20 = vsub.f32 %v2354_v6, %v278_v14  ;;  %v296_v25 = vmul.f32 %v285_v18, %v2504_v15  ;;  %v289_v26 = vmul.f32 %v285_v18, %v2453_v2  ;;  %v291_v27 = vmul.f32 %v285_v18, %v2463_v4 }
 0x14a   :  { %v290_v29 = vmul.f32 %v285_v18, %v2458_v3  ;;  %v292_v39 = vmul.f32 %v285_v18, %v2468_v5  ;;  %v294_v5 = vmul.f32 %v285_v18, %v2480_v8  ;;  %v293_v46 = vmul.f32 %v285_v18, %v2475_v7 }
 0x14b   :  { %v307_v24 = vperm.slane %v282_v20, 0  ;;  %v284_v8 = vrot.slane %v277_v1, 1  ;;  %v295_v7 = vmul.f32 %v285_v18, %v2489_v11  ;;  %v306_v54 = vrot.slane %v282_v20, 1 }
 0x14d   :  { %v318_v32 = vadd.f32 %v307_v24, %v296_v25  ;;  %v311_v33 = vadd.f32 %v307_v24, %v289_v26  ;;  %v313_v34 = vadd.f32 %v307_v24, %v291_v27  ;;  %v312_v35 = vadd.f32 %v307_v24, %v290_v29 }
 0x14e   :  { %v314_v40 = vadd.f32 %v307_v24, %v292_v39  ;;  %v316_v47 = vadd.f32 %v307_v24, %v294_v5  ;;  %v315_v48 = vadd.f32 %v307_v24, %v293_v46  ;;  %v317_v55 = vadd.f32 %v307_v24, %v295_v7  ;;  %v2800_v7 = vpop.permute.xlu0 %1675 }
 0x14f   :  { %v363_v36 = vmul.f32 %v2656_v31, %v318_v32  ;;  %v356_v30 = vmul.f32 %v2656_v31, %v311_v33  ;;  %v358_v15 = vmul.f32 %v2656_v31, %v313_v34  ;;  %v357_v3 = vmul.f32 %v2656_v31, %v312_v35  ;;  %4167 = vst [vmem:[#allocation5_spill] sm:$0xff] %v2800_v7 }
 0x150   :  { %v359_v43 = vmul.f32 %v2656_v31, %v314_v40  ;;  %v361_v50 = vmul.f32 %v2656_v31, %v316_v47  ;;  %v360_v51 = vmul.f32 %v2656_v31, %v315_v48  ;;  %v2693_v56 = vperm.slane %v284_v8, 0 }
 0x151   :  { %vm379_vm12 = vcmp.ge.f32.partialorder %v363_v36, 0.0  ;;  %vm372_vm13 = vcmp.ge.f32.partialorder %v356_v30, 0.0  ;;  %vm374_vm14 = vcmp.ge.f32.partialorder %v358_v15, 0.0  ;;  %vm373_vm15 = vcmp.ge.f32.partialorder %v357_v3, 0.0 }
 0x152   :  { %v2661_v37 = vsel %vm379_vm12, %v318_v32, 0.0  ;;  %v2663_v2 = vsel %vm372_vm13, %v311_v33, 0.0  ;;  %v2672_v41 = vsel %vm374_vm14, %v313_v34, 0.0  ;;  %v2674_v42 = vsel %vm373_vm15, %v312_v35, 0.0 }
 0x153   :  { %v411_v4 = vsub.f32 %v318_v32, %v2661_v37  ;;  %v404_v38 = vsub.f32 %v311_v33, %v2663_v2  ;;  %v406_v44 = vsub.f32 %v313_v34, %v2672_v41  ;;  %v405_v45 = vsub.f32 %v312_v35, %v2674_v42 }
 0x154   :  { %vm375_vm1 = vcmp.ge.f32.partialorder %v359_v43, 0.0  ;;  %vm377_vm3 = vcmp.ge.f32.partialorder %v361_v50, 0.0  ;;  %vm376_vm5 = vcmp.ge.f32.partialorder %v360_v51, 0.0  ;;  %v2697_v58 = vperm.slane %v306_v54, 0  ;;  %v566_v50 = vld [vmem:[%s4138_s5 + $0x8] sm:$0xff] }
 0x155   :  { %498 = vrot.lane.b32.xlu1 %v411_v4, %s2390_s30  ;;  %450 = vrot.lane.b32.xlu0 %v411_v4, %s2393_s2  ;;  %v2684_v49 = vsel %vm375_vm1, %v314_v40, 0.0  ;;  %v2695_v57 = vsel %vm377_vm3, %v316_v47, 0.0  ;;  %v2699_v60 = vsel %vm376_vm5, %v315_v48, 0.0  ;;  %v362_v11 = vmul.f32 %v2656_v31, %v317_v55 }
 0x156   :  { %436 = vrot.lane.b32.xlu2 %v404_v38, %s2393_s2  ;;  %v407_v53 = vsub.f32 %v314_v40, %v2684_v49  ;;  %v409_v61 = vsub.f32 %v316_v47, %v2695_v57  ;;  %v299_v62 = vmul.f32 %v2693_v56, %v2509_v16  ;;  %v408_v63 = vsub.f32 %v315_v48, %v2699_v60  ;;  %v2780_v47 = vpop.permute.xlu2 %2335 }
 0x157   :  { %v297_v0 = vmul.f32 %v2693_v56, %v2494_v12  ;;  %vm378_vm6 = vcmp.ge.f32.partialorder %v362_v11, 0.0  ;;  %v300_v12 = vmul.f32 %v2693_v56, %v2514_v17  ;;  %v298_v14 = vmul.f32 %v2693_v56, %v2499_v13  ;;  %2313 = vmatpush.msra.mxu2 %v566_v50  ;;  %629 = vmatpush.msra.mxu1 %v566_v50 }
 0x158   :  { %v321_v59 = vadd.f32 %v2697_v58, %v299_v62  ;;  %v2713_v6 = vsel %vm378_vm6, %v317_v55, 0.0  ;;  %v302_v26 = vmul.f32 %v2693_v56, %v2530_v22  ;;  %v303_v35 = vmul.f32 %v2693_v56, %v2535_v23 }
 0x159   :  { %v319_v1 = vadd.f32 %v2697_v58, %v297_v0  ;;  %v410_v10 = vsub.f32 %v317_v55, %v2713_v6  ;;  %v322_v18 = vadd.f32 %v2697_v58, %v300_v12  ;;  %v320_v19 = vadd.f32 %v2697_v58, %v298_v14 }
 0x15a   :  { %v366_v16 = vmul.f32 %v2656_v31, %v321_v59  ;;  %v324_v29 = vadd.f32 %v2697_v58, %v302_v26  ;;  %v301_v30 = vmul.f32 %v2693_v56, %v2525_v21  ;;  %v325_v15 = vadd.f32 %v2697_v58, %v303_v35 }
 0x15b   :  { %v364_v9 = vmul.f32 %v2656_v31, %v319_v1  ;;  %v367_v17 = vmul.f32 %v2656_v31, %v322_v18  ;;  %v365_v13 = vmul.f32 %v2656_v31, %v320_v19  ;;  %v304_v5 = vmul.f32 %v2693_v56, %v2544_v28 }
 0x15c   :  { %vm382_vm7 = vcmp.ge.f32.partialorder %v366_v16, 0.0  ;;  %v369_v34 = vmul.f32 %v2656_v31, %v324_v29  ;;  %v323_v3 = vadd.f32 %v2697_v58, %v301_v30  ;;  %v370_v23 = vmul.f32 %v2656_v31, %v325_v15 }
 0x15d   :  { %488 = vrot.lane.b32.xlu0 %v406_v44, %s2390_s30  ;;  %484 = vrot.lane.b32.xlu1 %v404_v38, %s2390_s30  ;;  %vm380_vm8 = vcmp.ge.f32.partialorder %v364_v9, 0.0  ;;  %v2727_v20 = vsel %vm382_vm7, %v321_v59, 0.0  ;;  %vm383_vm9 = vcmp.ge.f32.partialorder %v367_v17, 0.0  ;;  %vm381_vm10 = vcmp.ge.f32.partialorder %v365_v13, 0.0 }
 0x15e   :  { %486 = vrot.lane.b32.xlu2 %v405_v45, %s2390_s30  ;;  %v2729_v24 = vsel %vm380_vm8, %v319_v1, 0.0  ;;  %v414_v25 = vsub.f32 %v321_v59, %v2727_v20  ;;  %v2741_v32 = vsel %vm383_vm9, %v322_v18, 0.0  ;;  %v2743_v33 = vsel %vm381_vm10, %v320_v19, 0.0  ;;  %v2793_v51 = vpop.permute.xlu2 %2340 }
 0x15f   :  { %v412_v27 = vsub.f32 %v319_v1, %v2729_v24  ;;  %v415_v22 = vsub.f32 %v322_v18, %v2741_v32  ;;  %v413_v36 = vsub.f32 %v320_v19, %v2743_v33  ;;  %vm385_vm11 = vcmp.ge.f32.partialorder %v369_v34, 0.0 }
 0x160   :  { %v2757_v4 = vsel %vm385_vm11, %v324_v29, 0.0  ;;  %v368_v38 = vmul.f32 %v2656_v31, %v323_v3  ;;  %vm386_vm12 = vcmp.ge.f32.partialorder %v370_v23, 0.0  ;;  %vm4146_vm15 = vcmask 64512  }
 0x161   :  { %v417_v39 = vsub.f32 %v324_v29, %v2757_v4  ;;  %v2765_v21 = vsel %vm386_vm12, %v325_v15, 0.0 }
 0x162   :  { %vm384_vm13 = vcmp.ge.f32.partialorder %v368_v38, 0.0  ;;  %v418_v43 = vsub.f32 %v325_v15, %v2765_v21 }
 0x163   :  { %v2767_v40 = vsel %vm384_vm13, %v323_v3, 0.0 }
 0x165   :  { %442 = vrot.lane.b32.xlu0 %v407_v53, %s2393_s2  ;;  %438 = vrot.lane.b32.xlu1 %v405_v45, %s2393_s2  ;;  %v326_v45 = vadd.f32 %v2697_v58, %v304_v5 }
 0x166   :  { %440 = vrot.lane.b32.xlu2 %v406_v44, %s2393_s2  ;;  %v416_v44 = vsub.f32 %v323_v3, %v2767_v40  ;;  %v2796_v8 = vpop.permute.xlu2 %2345 }
 0x167   :  { %v371_v46 = vmul.f32 %v2656_v31, %v326_v45  ;;  %v565_v31 = vld [vmem:[%s4138_s5] sm:$0xff]  ;;  %4165 = vst [vmem:[#allocation3_spill] sm:$0xff] %v2796_v8  ;;  %s2394_s5 = smov 16  }
 0x168   :  { %2314 = vmatpush.msra.mxu2 %v565_v31  ;;  %630 = vmatpush.msra.mxu1 %v565_v31 }
 0x169   :  { %vm387_vm14 = vcmp.ge.f32.partialorder %v371_v46, 0.0 }
 0x16a   :  { %v2782_v48 = vsel %vm387_vm14, %v326_v45, 0.0 }
 0x16b   :  { %v419_v28 = vsub.f32 %v326_v45, %v2782_v48 }
 0x16d   :  { %494 = vrot.lane.b32.xlu0 %v409_v61, %s2390_s30  ;;  %490 = vrot.lane.b32.xlu1 %v407_v53, %s2390_s30  ;;  %v2798_v53 = vpop.permute.xlu1 %2350 }
 0x16e   :  { %492 = vrot.lane.b32.xlu2 %v408_v63, %s2390_s30  ;;  %4166 = vst [vmem:[#allocation4_spill] sm:$0xff] %v2798_v53 }
 0x175   :  { %448 = vrot.lane.b32.xlu0 %v410_v10, %s2393_s2  ;;  %444 = vrot.lane.b32.xlu1 %v408_v63, %s2393_s2 }
 0x176   :  { %446 = vrot.lane.b32.xlu2 %v409_v61, %s2393_s2 }
 0x17d   :  { %496 = vrot.lane.b32.xlu1 %v410_v10, %s2390_s30  ;;  %504 = vrot.lane.b32.xlu0 %v414_v25, %s2390_s30 }
 0x17e   :  { %500 = vrot.lane.b32.xlu2 %v412_v27, %s2390_s30 }
 0x185   :  { %458 = vrot.lane.b32.xlu0 %v415_v22, %s2393_s2  ;;  %452 = vrot.lane.b32.xlu1 %v412_v27, %s2393_s2 }
 0x186   :  { %454 = vrot.lane.b32.xlu2 %v413_v36, %s2393_s2 }
 0x18d   :  { %510 = vrot.lane.b32.xlu0 %v417_v39, %s2390_s30  ;;  %502 = vrot.lane.b32.xlu1 %v413_v36, %s2390_s30 }
 0x18e   :  { %456 = vrot.lane.b32.xlu2 %v414_v25, %s2393_s2 }
 0x195   :  { %464 = vrot.lane.b32.xlu0 %v418_v43, %s2393_s2  ;;  %506 = vrot.lane.b32.xlu1 %v415_v22, %s2390_s30 }
 0x196   :  { %508 = vrot.lane.b32.xlu2 %v416_v44, %s2390_s30 }
 0x19d   :  { %460 = vrot.lane.b32.xlu1 %v416_v44, %s2393_s2 }
 0x19e   :  { %462 = vrot.lane.b32.xlu2 %v417_v39, %s2393_s2 }
 0x1a5   :  { %512 = vrot.lane.b32.xlu1 %v418_v43, %s2390_s30 }
 0x1a6   :  { %514 = vrot.lane.b32.xlu2 %v419_v28, %s2390_s30 }
 0x1ad   :  { %466 = vrot.lane.b32.xlu1 %v419_v28, %s2393_s2 }
 0x1b0   :  { %v437_v54 = vpop.permute.xlu2 %436 }
 0x1b8   :  { %v487_v11 = vpop.permute.xlu2 %486 }
 0x1c0   :  { %v441_v59 = vpop.permute.xlu2 %440 }
 0x1c7   :  { %v499_v55 = vpop.permute.xlu1 %498  ;;  %v451_v56 = vpop.permute.xlu0 %450 }
 0x1c8   :  { %v540_v58 = vsel %vm4146_vm15, %v451_v56, %v499_v55  ;;  %v493_v12 = vpop.permute.xlu2 %492 }
 0x1c9   :  { %v556_v61 = vadd.f32 %v540_v58, %v2661_v37 }
 0x1cb   :  { %2288 = vmatmul.msk.f32.vlgmr.msra.gmra.mxu2 %vm4144_vm0, %v556_v61 }
 0x1cf   :  { %v485_v62 = vpop.permute.xlu1 %484  ;;  %v489_v10 = vpop.permute.xlu0 %488 }
 0x1d0   :  { %v533_v63 = vsel %vm4146_vm15, %v437_v54, %v485_v62  ;;  %v535_v37 = vsel %vm4146_vm15, %v441_v59, %v489_v10  ;;  %v447_v17 = vpop.permute.xlu2 %446  ;;  %v696_v59 = vlaneseq }
 0x1d1   :  { %v549_v0 = vadd.f32 %v533_v63, %v2663_v2  ;;  %v551_v18 = vadd.f32 %v535_v37, %v2672_v41 }
 0x1d3   :  { %2281 = vmatmul.msk.f32.vlgmr.msra.gmra.mxu1 %vm4144_vm0, %v549_v0 }
 0x1d7   :  { %v439_v1 = vpop.permute.xlu1 %438  ;;  %v443_v2 = vpop.permute.xlu0 %442 }
 0x1d8   :  { %v534_v16 = vsel %vm4146_vm15, %v439_v1, %v487_v11  ;;  %v501_v29 = vpop.permute.xlu2 %500 }
 0x1d9   :  { %v550_v9 = vadd.f32 %v534_v16, %v2674_v42 }
 0x1db   :  { %2282 = vmatmul.msk.f32.gmra.mxu1 %vm4144_vm0, %v550_v9 }
 0x1df   :  { %v491_v14 = vpop.permute.xlu1 %490  ;;  %v495_v26 = vpop.permute.xlu0 %494 }
 0x1e0   :  { %v536_v19 = vsel %vm4146_vm15, %v443_v2, %v491_v14  ;;  %v538_v41 = vsel %vm4146_vm15, %v447_v17, %v495_v26  ;;  %v455_v15 = vpop.permute.xlu2 %454 }
 0x1e1   :  { %v552_v25 = vadd.f32 %v536_v19, %v2684_v49  ;;  %v554_v36 = vadd.f32 %v538_v41, %v2695_v57 }
 0x1e3   :  { %2283 = vmatmul.msk.f32.gmra.mxu1 %vm4144_vm0, %v551_v18 }
 0x1e7   :  { %v445_v13 = vpop.permute.xlu1 %444  ;;  %v449_v30 = vpop.permute.xlu0 %448 }
 0x1e8   :  { %v537_v42 = vsel %vm4146_vm15, %v445_v13, %v493_v12  ;;  %v457_v57 = vpop.permute.xlu2 %456 }
 0x1e9   :  { %v553_v34 = vadd.f32 %v537_v42, %v2699_v60 }
 0x1eb   :  { %2284 = vmatmul.msk.f32.gmra.mxu1 %vm4144_vm0, %v552_v25 }
 0x1ef   :  { %v497_v27 = vpop.permute.xlu1 %496  ;;  %v505_v43 = vpop.permute.xlu0 %504 }
 0x1f0   :  { %v539_v3 = vsel %vm4146_vm15, %v449_v30, %v497_v27  ;;  %v509_v28 = vpop.permute.xlu2 %508 }
 0x1f1   :  { %v555_v38 = vadd.f32 %v539_v3, %v2713_v6 }
 0x1f3   :  { %2285 = vmatmul.msk.f32.gmra.mxu1 %vm4144_vm0, %v553_v34 }
 0x1f7   :  { %v453_v22 = vpop.permute.xlu1 %452  ;;  %v459_v45 = vpop.permute.xlu0 %458 }
 0x1f8   :  { %v541_v35 = vsel %vm4146_vm15, %v453_v22, %v501_v29 }
 0x1f9   :  { %v557_v49 = vadd.f32 %v541_v35, %v2729_v24  ;;  %v543_v24 = vsel %vm4146_vm15, %v457_v57, %v505_v43 }
 0x1fa   :  { %v559_v44 = vadd.f32 %v543_v24, %v2727_v20  ;;  %v463_v20 = vpop.permute.xlu2 %462 }
 0x1fb   :  { %2286 = vmatmul.msk.f32.gmra.mxu1 %vm4144_vm0, %v554_v36  ;;  %2289 = vmatmul.msk.f32.gmra.mxu2 %vm4144_vm0, %v557_v49 }
 0x1ff   :  { %v503_v60 = vpop.permute.xlu1 %502  ;;  %v511_v54 = vpop.permute.xlu0 %510 }
 0x200   :  { %v542_v23 = vsel %vm4146_vm15, %v455_v15, %v503_v60  ;;  %v546_v55 = vsel %vm4146_vm15, %v463_v20, %v511_v54 }
 0x201   :  { %v558_v39 = vadd.f32 %v542_v23, %v2743_v33  ;;  %v562_v56 = vadd.f32 %v546_v55, %v2757_v4  ;;  %v2850_v4 = vshrl.u32 %v696_v59, 7 }
 0x203   :  { %2287 = vmatmul.msk.f32.gmra.mxu1 %vm4144_vm0, %v555_v38  ;;  %2290 = vmatmul.msk.f32.gmra.mxu2 %vm4144_vm0, %v558_v39  ;;  %v698_v16 = vadd.s32 8, %v2850_v4  ;;  %v2864_v10 = vadd.s32 16, %v2850_v4  ;;  %v709_v18 = vand.u32 7, %v2850_v4  ;;  %v703_v13 = vadd.s32 48, %v2850_v4 }
 0x204   :  { %v2884_v25 = vadd.s32 24, %v2850_v4  ;;  %v2909_v30 = vadd.s32 32, %v2850_v4  ;;  %v3008_v59 = vadd.s32 56, %v2850_v4 }
 0x205   :  { %v716_v9 = vand.u32 7, %v698_v16  ;;  %v723_v19 = vand.u32 7, %v2864_v10  ;;  %vm2878_vm3 = vcmp.ne.s32.totalorder %v709_v18, 0  ;;  %v751_v34 = vand.u32 7, %v703_v13 }
 0x206   :  { %v730_v22 = vand.u32 7, %v2884_v25  ;;  %v737_v43 = vand.u32 7, %v2909_v30  ;;  %vm3076_vm14 = vcmp.ne.s32.totalorder %v709_v18, 7 }
 0x207   :  { %v507_v5 = vpop.permute.xlu1 %506  ;;  %vm2859_vm1 = vcmp.ne.s32.totalorder %v716_v9, 0  ;;  %vm2888_vm5 = vcmp.ne.s32.totalorder %v723_v19, 0  ;;  %vm2904_vm6 = vcmp.ne.s32.totalorder %v751_v34, 7  ;;  %vm2934_vm8 = vcmp.ne.s32.totalorder %v716_v9, 7 }
 0x208   :  { %v544_v46 = vsel %vm4146_vm15, %v459_v45, %v507_v5  ;;  %vm2913_vm7 = vcmp.ne.s32.totalorder %v730_v22, 0  ;;  %vm2942_vm9 = vcmp.ne.s32.totalorder %v737_v43, 0  ;;  %v702_v5 = vadd.s32 40, %v2850_v4 }
 0x209   :  { %v560_v6 = vadd.f32 %v544_v46, %v2741_v32  ;;  %v465_v32 = vpop.permute.xlu0 %464  ;;  %vm2988_vm12 = vcmp.ne.s32.totalorder %v751_v34, 0  ;;  %vm3167_vm2 = vcmp.ne.s32.totalorder %v730_v22, 7 }
 0x20b   :  { %2291 = vmatmul.msk.f32.gmra.mxu2 %vm4144_vm0, %v559_v44  ;;  %v4277_v44 = vmov 0.0  }
 0x20f   :  { %v461_v33 = vpop.permute.xlu1 %460 }
 0x210   :  { %v545_v50 = vsel %vm4146_vm15, %v461_v33, %v509_v28  ;;  %v744_v33 = vand.u32 7, %v702_v5 }
 0x211   :  { %v561_v31 = vadd.f32 %v545_v50, %v2767_v40  ;;  %v515_v40 = vpop.permute.xlu2 %514 }
 0x212   :  { %vm2961_vm10 = vcmp.ne.s32.totalorder %v744_v33, 0  ;;  %vm2982_vm11 = vcmp.ne.s32.totalorder %v744_v33, 7 }
 0x213   :  { %2292 = vmatmul.msk.f32.gmra.mxu2 %vm4144_vm0, %v560_v6 }
 0x217   :  { %v513_v58 = vpop.permute.xlu1 %512 }
 0x218   :  { %v547_v11 = vsel %vm4146_vm15, %v465_v32, %v513_v58 }
 0x219   :  { %v563_v61 = vadd.f32 %v547_v11, %v2765_v21 }
 0x21b   :  { %2293 = vmatmul.msk.f32.gmra.mxu2 %vm4144_vm0, %v561_v31 }
 0x21f   :  { %v467_v62 = vpop.permute.xlu1 %466 }
 0x220   :  { %v548_v63 = vsel %vm4146_vm15, %v467_v62, %v515_v40  ;;  %vm4149_vm15 = vcmask 97280  }
 0x221   :  { %v564_v0 = vadd.f32 %v548_v63, %v2782_v48  ;;  %v1910_v48 = vld [vmem:[%s4139_s6 + $0x18] sm:$0xff] }
 0x223   :  { %2294 = vmatmul.msk.f32.gmra.mxu2 %vm4144_vm0, %v562_v56 }
 0x22b   :  { %2295 = vmatmul.msk.f32.gmra.mxu2 %vm4144_vm0, %v563_v61 }
 0x233   :  { %2296 = vmatmul.msk.f32.gmra.mxu2 %vm4144_vm0, %v564_v0  ;;  %vm3211_vm0 = vcmp.ne.s32.totalorder %v737_v43, 7 }
 0x24e   :  { %v2852_v1 = vpop.f32.mrf.mxu2 }
 0x24f   :  { %4168 = vst [vmem:[#allocation6_spill] sm:$0xff] %v2852_v1 }
 0x250   :  { %687 = vst.msk [vmem:[#allocation2 + $0x48] sm:$0xff] %vm4161_vm4, %v2852_v1  ;;  %v632_v21 = vpop.f32.mrf.mxu1 }
 0x251   :  { %680 = vst.msk [vmem:[#allocation2 + $0x10] sm:$0xff] %vm4161_vm4, %v632_v21  ;;  %1709 = vrot.lane.b32.xlu0 %v632_v21, %s2388_s4 }
 0x257   :  { %v1029_v36 = vld [vmem:[#allocation2 + $0x49] sm:$0xff] }
 0x258   :  { %v635_v12 = vpop.f32.mrf.mxu1  ;;  %v890_v37 = vld [vmem:[#allocation2 + $0x10] sm:$0xff]  ;;  %v1171_v3 = vsel %vm2904_vm6, %v1029_v36, 0.0  ;;  %v3013_v9 = vld [vmem:[#allocation2 + $0x48] sm:$0xff] }
 0x259   :  { %v2866_v14 = vld [vmem:[#allocation2 + $0xf] sm:$0xff]  ;;  %681 = vst.msk [vmem:[#allocation2 + $0x18] sm:$0xff] %vm4161_vm4, %v635_v12  ;;  %1199 = vrot.lane.b32.xlu0 %v890_v37, %s2389_s28  ;;  %1389 = vrot.lane.b32.xlu2 %v890_v37, %s2394_s5  ;;  %v4142_v37 = vand.u32 7, %v3008_v59 }
 0x25a   :  { %v1011_v27 = vsel %vm2878_vm3, %v2866_v14, 0.0  ;;  %4189 = vst [vmem:[#allocation7_spill] sm:$0xff] %v3013_v9 }
 0x25b   :  { %vm3027_vm13 = vcmp.ne.s32.totalorder %v4142_v37, 0 }
 0x260   :  { %v638_v26 = vpop.f32.mrf.mxu1  ;;  %v2895_v29 = vld [vmem:[#allocation2 + $0x17] sm:$0xff] }
 0x261   :  { %682 = vst.msk [vmem:[#allocation2 + $0x20] sm:$0xff] %vm4161_vm4, %v638_v26  ;;  %1325 = vrot.lane.b32.xlu0 %v1011_v27, %s2395_s3  ;;  %1711 = vrot.lane.b32.xlu2 %v635_v12, %s2388_s4  ;;  %v2919_v60 = vld [vmem:[#allocation2 + $0x18] sm:$0xff]  ;;  %v1089_v54 = vsel %vm2878_vm3, %v2895_v29, 0.0  ;;  %v1012_v20 = vsel %vm2859_vm1, %v2895_v29, 0.0 }
 0x262   :  { %v2938_v24 = vld [vmem:[#allocation2 + $0x11] sm:$0xff] }
 0x263   :  { %v978_v46 = vsel %vm2934_vm8, %v2938_v24, 0.0 }
 0x268   :  { %v641_v15 = vpop.f32.mrf.mxu1  ;;  %v2921_v23 = vld [vmem:[#allocation2 + $0x1f] sm:$0xff] }
 0x269   :  { %683 = vst.msk [vmem:[#allocation2 + $0x28] sm:$0xff] %vm4161_vm4, %v641_v15  ;;  %1657 = vrot.lane.b32.xlu0 %v1171_v3, %s2388_s4  ;;  %1581 = vrot.lane.b32.xlu2 %v2919_v60, %s2391_s9  ;;  %v1013_v38 = vsel %vm2888_vm5, %v2921_v23, 0.0  ;;  %v2994_v62 = vld [vmem:[#allocation2 + $0x20] sm:$0xff] }
 0x26a   :  { %v3053_v33 = vld [vmem:[#allocation2 + $0x19] sm:$0xff] }
 0x270   :  { %v2947_v45 = vpop.f32.mrf.mxu1  ;;  %v2952_v6 = vld [vmem:[#allocation2 + $0x27] sm:$0xff] }
 0x271   :  { %684 = vst.msk [vmem:[#allocation2 + $0x30] sm:$0xff] %vm4161_vm4, %v2947_v45  ;;  %1263 = vrot.lane.b32.xlu0 %v978_v46, %s2390_s30  ;;  %1713 = vrot.lane.b32.xlu2 %v638_v26, %s2388_s4  ;;  %v4190_v26 = vmov 0  ;;  %v3123_v4 = vld [vmem:[#allocation2 + $0x28] sm:$0xff] }
 0x272   :  { %v4191_v26 = vsel %vm3027_vm13, 4294967295, %v4190_v26  ;;  %v940_v37 = vld [vmem:[#allocation2 + $0x21] sm:$0xff]  ;;  %vm4206_vm13 = vcmask 64512  }
 0x273   :  { %4192 = vst [vmem:[#allocation8_spill] sm:$0xff] %v4191_v26  ;;  %v980_v10 = vsel %vm3167_vm2, %v940_v37, 0.0 }
 0x278   :  { %v2965_v31 = vpop.f32.mrf.mxu1  ;;  %v2973_v55 = vld [vmem:[#allocation2 + $0x2f] sm:$0xff] }
 0x279   :  { %685 = vst.msk [vmem:[#allocation2 + $0x38] sm:$0xff] %vm4161_vm4, %v2965_v31  ;;  %1517 = vrot.lane.b32.xlu0 %v1089_v54, %s2392_s10  ;;  %1327 = vrot.lane.b32.xlu2 %v1012_v20, %s2395_s3  ;;  %v1048_v20 = vsel %vm2934_vm8, %v3053_v33, 0.0 }
 0x27e   :  { %v656_v58 = vpop.f32.mrf.mxu2 }
 0x27f   :  { %688 = vst.msk [vmem:[#allocation2 + $0x70] sm:$0xff] %vm4161_vm4, %v656_v58  ;;  %1725 = vrot.lane.b32.xlu1 %v656_v58, %s2388_s4 }
 0x280   :  { %v2992_v61 = vpop.f32.mrf.mxu1  ;;  %v2996_v40 = vld [vmem:[#allocation2 + $0x31] sm:$0xff] }
 0x281   :  { %v2998_v63 = vld [vmem:[#allocation2 + $0x37] sm:$0xff]  ;;  %686 = vst.msk [vmem:[#allocation2 + $0x40] sm:$0xff] %vm4161_vm4, %v2992_v61  ;;  %1203 = vrot.lane.b32.xlu2 %v2994_v62, %s2389_s28 }
 0x286   :  { %v659_v21 = vpop.f32.mrf.mxu2  ;;  %v3015_v12 = vld [vmem:[#allocation2 + $0x6f] sm:$0xff] }
 0x287   :  { %689 = vst.msk [vmem:[#allocation2 + $0x78] sm:$0xff] %vm4161_vm4, %v659_v21  ;;  %1593 = vrot.lane.b32.xlu1 %v3013_v9, %s2391_s9  ;;  %1727 = vrot.lane.b32.xlu0 %v659_v21, %s2388_s4  ;;  %v1019_v3 = vsel %vm2878_vm3, %v3015_v12, 0.0 }
 0x288   :  { %v3032_v27 = vld [vmem:[#allocation2 + $0x3f] sm:$0xff] }
 0x289   :  { %1715 = vrot.lane.b32.xlu2 %v641_v15, %s2388_s4  ;;  %v1090_v15 = vsel %vm2859_vm1, %v2921_v23, 0.0  ;;  %v3443_v9 = vld [vmem:[#allocation2 + $0x39] sm:$0xff] }
 0x28e   :  { %v662_v36 = vpop.f32.mrf.mxu2  ;;  %v3040_v5 = vld [vmem:[#allocation2 + $0x77] sm:$0xff] }
 0x28f   :  { %690 = vst.msk [vmem:[#allocation2 + $0x80] sm:$0xff] %vm4161_vm4, %v662_v36  ;;  %1201 = vrot.lane.b32.xlu1 %v2919_v60, %s2389_s28  ;;  %1341 = vrot.lane.b32.xlu0 %v1019_v3, %s2395_s3  ;;  %v3067_v21 = vld [vmem:[#allocation2 + $0x78] sm:$0xff] }
 0x290   :  { %v3119_v18 = vld [vmem:[#allocation2 + $0x71] sm:$0xff] }
 0x291   :  { %1519 = vrot.lane.b32.xlu2 %v1090_v15, %s2392_s10 }
 0x296   :  { %v3055_v54 = vpop.f32.mrf.mxu2  ;;  %v3060_v58 = vld [vmem:[#allocation2 + $0x7f] sm:$0xff] }
 0x297   :  { %691 = vst.msk [vmem:[#allocation2 + $0x88] sm:$0xff] %vm4161_vm4, %v3055_v54  ;;  %1391 = vrot.lane.b32.xlu1 %v2919_v60, %s2394_s5  ;;  %1455 = vrot.lane.b32.xlu0 %v1048_v20, %s2396_s17  ;;  %v1047_v60 = vsel %vm3076_vm14, %v2938_v24, 0.0  ;;  %v1097_v20 = vsel %vm2878_vm3, %v3040_v5, 0.0  ;;  %v898_v24 = vld [vmem:[#allocation2 + $0x70] sm:$0xff]  ;;  %vm3161_vm3 = vcmp.ne.s32.totalorder %v723_v19, 7  ;;  %v947_v7 = vld [vmem:[#allocation2 + $0x79] sm:$0xff] }
 0x298   :  { %v979_v22 = vsel %vm3161_vm3, %v3053_v33, 0.0 }
 0x299   :  { %1217 = vrot.lane.b32.xlu2 %v3067_v21, %s2389_s28 }
 0x29e   :  { %v3080_v52 = vpop.f32.mrf.mxu2  ;;  %v3088_v34 = vld [vmem:[#allocation2 + $0x81] sm:$0xff] }
 0x29f   :  { %v3090_v56 = vld [vmem:[#allocation2 + $0x87] sm:$0xff]  ;;  %692 = vst.msk [vmem:[#allocation2 + $0x90] sm:$0xff] %vm4161_vm4, %v3080_v52  ;;  %1453 = vrot.lane.b32.xlu1 %v1047_v60, %s2396_s17  ;;  %1533 = vrot.lane.b32.xlu0 %v1097_v20, %s2392_s10  ;;  %v1020_v60 = vsel %vm2859_vm1, %v3040_v5, 0.0 }
 0x2a0   :  { %4195 = vst [vmem:[#allocation9_spill] sm:$0xff] %v3090_v56  ;;  %v1022_v42 = vsel %vm2913_vm7, %v3090_v56, 0.0 }
 0x2a1   :  { %1407 = vrot.lane.b32.xlu2 %v3067_v21, %s2394_s5 }
 0x2a6   :  { %v3104_v17 = vpop.f32.mrf.mxu2  ;;  %v3109_v16 = vld [vmem:[#allocation2 + $0x8f] sm:$0xff] }
 0x2a7   :  { %693 = vst.msk [vmem:[#allocation2 + $0x98] sm:$0xff] %vm4161_vm4, %v3104_v17  ;;  %1215 = vrot.lane.b32.xlu1 %v898_v24, %s2389_s28  ;;  %1343 = vrot.lane.b32.xlu0 %v1020_v60, %s2395_s3  ;;  %v949_v8 = vld [vmem:[#allocation2 + $0x89] sm:$0xff] }
 0x2a8   :  { %v1058_v41 = vsel %vm3167_vm2, %v949_v8, 0.0 }
 0x2a9   :  { %1729 = vrot.lane.b32.xlu2 %v662_v36, %s2388_s4  ;;  %v1055_v36 = vsel %vm3076_vm14, %v3119_v18, 0.0 }
 0x2ae   :  { %v3121_v0 = vpop.f32.mrf.mxu2  ;;  %v3125_v3 = vld [vmem:[#allocation2 + $0x97] sm:$0xff] }
 0x2af   :  { %694 = vst.msk [vmem:[#allocation2 + $0xa0] sm:$0xff] %vm4161_vm4, %v3121_v0  ;;  %1405 = vrot.lane.b32.xlu1 %v898_v24, %s2394_s5  ;;  %1205 = vrot.lane.b32.xlu0 %v3123_v4, %s2389_s28  ;;  %v1166_v24 = vsel %vm2934_vm8, %v940_v37, 0.0 }
 0x2b1   :  { %1469 = vrot.lane.b32.xlu2 %v1055_v36, %s2396_s17 }
 0x2b3   :  { %v3139_v20 = vpop.permute.xlu2 %1389 }
 0x2b6   :  { %v3141_v28 = vpop.f32.mrf.mxu2  ;;  %v3145_v13 = vld [vmem:[#allocation2 + $0x9f] sm:$0xff] }
 0x2b7   :  { %4196 = vst [vmem:[#allocation10_spill] sm:$0xff] %v3141_v28  ;;  %1583 = vrot.lane.b32.xlu1 %v2994_v62, %s2391_s9  ;;  %1647 = vrot.lane.b32.xlu0 %v1166_v24, %s2388_s4  ;;  %v1049_v24 = vsel %vm3161_vm3, %v940_v37, 0.0 }
 0x2b8   :  { %695 = vst.msk [vmem:[#allocation2 + $0xa8] sm:$0xff] %vm4161_vm4, %v3141_v28  ;;  %v3453_v28 = vld [vmem:[#allocation2 + $0x90] sm:$0xff] }
 0x2b9   :  { %1717 = vrot.lane.b32.xlu2 %v2947_v45, %s2388_s4  ;;  %v3186_v45 = vld [vmem:[#allocation2 + $0x80] sm:$0xff] }
 0x2bb   :  { %v3157_v60 = vpop.permute.xlu2 %1711 }
 0x2bf   :  { %1393 = vrot.lane.b32.xlu1 %v2994_v62, %s2394_s5  ;;  %1457 = vrot.lane.b32.xlu0 %v1049_v24, %s2396_s17  ;;  %v1091_v62 = vsel %vm2888_vm5, %v2952_v6, 0.0 }
 0x2c1   :  { %1267 = vrot.lane.b32.xlu2 %v980_v10, %s2390_s30  ;;  %v1165_v10 = vsel %vm3076_vm14, %v3053_v33, 0.0  ;;  %v941_v33 = vld [vmem:[#allocation2 + $0x29] sm:$0xff] }
 0x2c2   :  { %v981_v39 = vsel %vm3211_vm0, %v941_v33, 0.0  ;;  %v1167_v53 = vsel %vm3161_vm3, %v941_v33, 0.0 }
 0x2c3   :  { %v3179_v19 = vpop.permute.xlu0 %1709  ;;  %v3181_v25 = vpop.permute.xlu2 %1581 }
 0x2c7   :  { %1265 = vrot.lane.b32.xlu1 %v979_v22, %s2390_s30  ;;  %1219 = vrot.lane.b32.xlu0 %v3186_v45, %s2389_s28  ;;  %v1098_v22 = vsel %vm2859_vm1, %v3060_v58, 0.0 }
 0x2c9   :  { %1521 = vrot.lane.b32.xlu2 %v1091_v62, %s2392_s10 }
 0x2cb   :  { %v1200_v37 = vpop.permute.xlu0 %1199  ;;  %v3195_v24 = vpop.permute.xlu2 %1713 }
 0x2cf   :  { %1645 = vrot.lane.b32.xlu1 %v1165_v10, %s2388_s4  ;;  %1535 = vrot.lane.b32.xlu0 %v1098_v22, %s2392_s10  ;;  %v4204_v10 = vsel %vm2913_vm7, %v2921_v23, 0.0  ;;  %v4205_v23 = vsel %vm2859_vm1, %v2866_v14, 0.0  ;;  %v1173_v14 = vsel %vm3076_vm14, %v947_v7, 0.0  ;;  %vm4159_vm14 = vcmask 195584  }
 0x2d1   :  { %1599 = vrot.lane.b32.xlu2 %v3186_v45, %s2391_s9 }
 0x2d3   :  { %v3207_v36 = vpop.permute.xlu0 %1325  ;;  %v1328_v62 = vpop.permute.xlu2 %1327 }
 0x2d7   :  { %1329 = vrot.lane.b32.xlu1 %v1013_v38, %s2395_s3  ;;  %1269 = vrot.lane.b32.xlu0 %v981_v39, %s2390_s30  ;;  %v987_v38 = vsel %vm3161_vm3, %v947_v7, 0.0  ;;  %v1758_v39 = vsel %vm4161_vm4, %v4205_v23, %v1200_v37 }
 0x2d9   :  { %1731 = vrot.lane.b32.xlu2 %v3055_v54, %s2388_s4 }
 0x2db   :  { %v3225_v30 = vpop.permute.xlu0 %1657  ;;  %v1204_v43 = vpop.permute.xlu2 %1203 }
 0x2dc   :  { %4203 = vst [vmem:[#allocation11_spill] sm:$0xff] %v3225_v30  ;;  %v3232_v22 = vsel %vm4161_vm4, %v4204_v10, %v1204_v43 }
 0x2df   :  { %1597 = vrot.lane.b32.xlu1 %v3067_v21, %s2391_s9  ;;  %1649 = vrot.lane.b32.xlu0 %v1167_v53, %s2388_s4  ;;  %v986_v53 = vsel %vm2934_vm8, %v3119_v18, 0.0  ;;  %v1021_v18 = vsel %vm2888_vm5, %v3060_v58, 0.0 }
 0x2e1   :  { %1281 = vrot.lane.b32.xlu2 %v987_v38, %s2390_s30  ;;  %v1050_v38 = vsel %vm3167_vm2, %v941_v33, 0.0 }
 0x2e3   :  { %v1264_v54 = vpop.permute.xlu0 %1263  ;;  %v3247_v43 = vpop.permute.xlu2 %1715 }
 0x2e4   :  { %v1774_v10 = vsel %vm4206_vm13, %v1758_v39, %v1264_v54  ;;  %v4207_v39 = vsel %vm2888_vm5, %v3040_v5, 0.0  ;;  %vm4160_vm13 = vcmask 162816  }
 0x2e5   :  { %v1791_v21 = vsel %vm4149_vm15, %v1774_v10, %v1328_v62  ;;  %v1057_v62 = vsel %vm3161_vm3, %v3088_v34, 0.0  ;;  %v988_v10 = vsel %vm3167_vm2, %v3088_v34, 0.0  ;;  %vm4212_vm15 = vcmask 130048  }
 0x2e7   :  { %1279 = vrot.lane.b32.xlu1 %v986_v53, %s2390_s30  ;;  %1459 = vrot.lane.b32.xlu0 %v1050_v38, %s2396_s17 }
 0x2e9   :  { %1661 = vrot.lane.b32.xlu2 %v1173_v14, %s2388_s4  ;;  %v1014_v14 = vsel %vm2913_vm7, %v2952_v6, 0.0 }
 0x2eb   :  { %v1520_v37 = vpop.permute.xlu2 %1519  ;;  %v3270_v33 = vpop.permute.xlu0 %1517 }
 0x2ef   :  { %1585 = vrot.lane.b32.xlu1 %v3123_v4, %s2391_s9  ;;  %1473 = vrot.lane.b32.xlu0 %v1057_v62, %s2396_s17  ;;  %v1168_v62 = vsel %vm3167_vm2, %v2996_v40, 0.0 }
 0x2f1   :  { %1345 = vrot.lane.b32.xlu2 %v1021_v18, %s2395_s3  ;;  %v3273_v15 = vpop.permute.xlu1 %1725 }
 0x2f3   :  { %v1218_v23 = vpop.permute.xlu2 %1217 }
 0x2f4   :  { %v3280_v54 = vsel %vm4161_vm4, %v4207_v39, %v1218_v23  ;;  %v4210_v23 = vsel %vm2888_vm5, %v2895_v29, 0.0 }
 0x2f7   :  { %1395 = vrot.lane.b32.xlu1 %v3123_v4, %s2394_s5  ;;  %1283 = vrot.lane.b32.xlu0 %v988_v10, %s2390_s30 }
 0x2f9   :  { %v3288_v53 = vpop.permute.xlu0 %1727  ;;  %1719 = vrot.lane.b32.xlu2 %v2965_v31, %s2388_s4  ;;  %v3292_v38 = vpop.permute.xlu1 %1593  ;;  %v1092_v31 = vsel %vm2913_vm7, %v2973_v55, 0.0 }
 0x2fa   :  { %4208 = vst [vmem:[#allocation12_spill] sm:$0xff] %v3288_v53  ;;  %v2342_v53 = vunpack.i.l.bf16 %v2793_v51 }
 0x2fb   :  { %4209 = vst [vmem:[#allocation13_spill] sm:$0xff] %v3292_v38  ;;  %v3294_v5 = vpop.permute.xlu2 %1407  ;;  %v3414_v38 = vld [vmem:[#allocation2 + $0x41] sm:$0xff] }
 0x2ff   :  { %1331 = vrot.lane.b32.xlu1 %v1014_v14, %s2395_s3  ;;  %1651 = vrot.lane.b32.xlu0 %v1168_v62, %s2388_s4  ;;  %v1051_v14 = vsel %vm3211_vm0, %v2996_v40, 0.0 }
 0x301   :  { %v3307_v4 = vpop.permute.xlu0 %1341  ;;  %1523 = vrot.lane.b32.xlu2 %v1092_v31, %s2392_s10  ;;  %v1202_v18 = vpop.permute.xlu1 %1201 }
 0x302   :  { %v3315_v39 = vsel %vm4161_vm4, %v4210_v23, %v1202_v18 }
 0x303   :  { %v3317_v10 = vpop.permute.xlu2 %1729 }
 0x304   :  { %4211 = vst [vmem:[#allocation14_spill] sm:$0xff] %v3317_v10 }
 0x307   :  { %1409 = vrot.lane.b32.xlu1 %v3186_v45, %s2394_s5  ;;  %1461 = vrot.lane.b32.xlu0 %v1051_v14, %s2396_s17  ;;  %v1056_v45 = vsel %vm2934_vm8, %v947_v7, 0.0  ;;  %v1175_v14 = vsel %vm3161_vm3, %v949_v8, 0.0  ;;  %v894_v7 = vld [vmem:[#allocation2 + $0x30] sm:$0xff]  ;;  %vm4224_vm3 = vcmask 97280  }
 0x309   :  { %v1456_v62 = vpop.permute.xlu0 %1455  ;;  %1733 = vrot.lane.b32.xlu2 %v3080_v52, %s2388_s4  ;;  %v1392_v29 = vpop.permute.xlu1 %1391  ;;  %v1099_v52 = vsel %vm2888_vm5, %v3090_v56, 0.0  ;;  %v1169_v56 = vsel %vm3211_vm0, %v3443_v9, 0.0 }
 0x30a   :  { %v1807_v31 = vsel %vm4212_vm15, %v1791_v21, %v1392_v29  ;;  %vm4215_vm15 = vcmask 64512  }
 0x30b   :  { %v1824_v18 = vsel %vm4160_vm13, %v1807_v31, %v1456_v62  ;;  %v3329_v23 = vpop.permute.xlu2 %1469  ;;  %vm4223_vm5 = vmmov %vm4215_vm15 }
 0x30c   :  { %v3332_v30 = vsel %vm4159_vm14, %v1824_v18, %v1520_v37  ;;  %v4214_v18 = vsel %vm2859_vm1, %v3015_v12, 0.0  ;;  %v1909_v12 = vld [vmem:[%s4139_s6 + $0x10] sm:$0xff] }
 0x30f   :  { %1471 = vrot.lane.b32.xlu1 %v1056_v45, %s2396_s17  ;;  %1665 = vrot.lane.b32.xlu0 %v1175_v14, %s2388_s4  ;;  %v1911_v14 = vld [vmem:[%s4139_s6 + $0x20] sm:$0xff] }
 0x310   :  { %1976 = vmatpush.msrb.mxu0 %v1911_v14  ;;  %2315 = vmatpush.msrb.mxu3 %v1911_v14 }
 0x311   :  { %v3343_v21 = vpop.permute.xlu0 %1533  ;;  %1537 = vrot.lane.b32.xlu2 %v1099_v52, %s2392_s10  ;;  %v3346_v37 = vpop.permute.xlu1 %1453 }
 0x312   :  { %1977 = vmatpush.msrb.mxu0 %v1910_v48  ;;  %2316 = vmatpush.msrb.mxu3 %v1910_v48  ;;  %v1907_v48 = vld [vmem:[%s4139_s6] sm:$0xff] }
 0x313   :  { %v3348_v62 = vpop.permute.xlu2 %1717 }
 0x314   :  { %4213 = vst [vmem:[#allocation15_spill] sm:$0xff] %v3348_v62  ;;  %1978 = vmatpush.msrb.mxu0 %v1909_v12  ;;  %2317 = vmatpush.msrb.mxu3 %v1909_v12 }
 0x317   :  { %1207 = vrot.lane.b32.xlu1 %v894_v7, %s2389_s28  ;;  %1475 = vrot.lane.b32.xlu0 %v1058_v41, %s2396_s17 }
 0x319   :  { %v3357_v29 = vpop.permute.xlu0 %1343  ;;  %1347 = vrot.lane.b32.xlu2 %v1022_v42, %s2395_s3  ;;  %v1216_v31 = vpop.permute.xlu1 %1215  ;;  %v989_v42 = vsel %vm3211_vm0, %v949_v8, 0.0  ;;  %v4216_v8 = vsel %vm2942_vm9, %v2952_v6, 0.0 }
 0x31a   :  { %v3365_v45 = vsel %vm4161_vm4, %v4214_v18, %v1216_v31  ;;  %v3387_v31 = vld [vmem:[#allocation2 + $0x38] sm:$0xff] }
 0x31b   :  { %v1268_v52 = vpop.permute.xlu2 %1267 }
 0x31c   :  { %v3372_v41 = vsel %vm4215_vm15, %v3232_v22, %v1268_v52  ;;  %v1908_v22 = vld [vmem:[%s4139_s6 + $0x8] sm:$0xff]  ;;  %vm4225_vm15 = vcmask 130048  }
 0x31d   :  { %1979 = vmatpush.msrb.mxu0 %v1908_v22  ;;  %2318 = vmatpush.msrb.mxu3 %v1908_v22  ;;  %v4218_v22 = vand.u32 7, %v3008_v59  ;;  %v1093_v59 = vsel %vm2942_vm9, %v2998_v63, 0.0 }
 0x31f   :  { %1587 = vrot.lane.b32.xlu1 %v894_v7, %s2391_s9  ;;  %1285 = vrot.lane.b32.xlu0 %v989_v42, %s2390_s30  ;;  %v3405_v42 = vld [vmem:[#allocation2 + $0x40] sm:$0xff]  ;;  %vm3418_vm1 = vcmp.ne.s32.totalorder %v4218_v22, 7 }
 0x320   :  { %1980 = vmatpush.msrb.mxu0 %v1907_v48  ;;  %2319 = vmatpush.msrb.mxu3 %v1907_v48  ;;  %v4219_v48 = vmov 0  ;;  %v984_v62 = vsel %vm3418_vm1, %v3414_v38, 0.0 }
 0x321   :  { %v1206_v18 = vpop.permute.xlu0 %1205  ;;  %1209 = vrot.lane.b32.xlu2 %v3387_v31, %s2389_s28  ;;  %v3391_v14 = vpop.permute.xlu1 %1405  ;;  %v4220_v48 = vsel %vm3418_vm1, 4294967295, %v4219_v48 }
 0x322   :  { %v3398_v52 = vsel %vm4161_vm4, %v4216_v8, %v1206_v18  ;;  %4221 = vst [vmem:[#allocation17_spill] sm:$0xff] %v4220_v48 }
 0x323   :  { %v3403_v12 = vpop.permute.xlu2 %1521 }
 0x327   :  { %1397 = vrot.lane.b32.xlu1 %v894_v7, %s2394_s5  ;;  %1211 = vrot.lane.b32.xlu0 %v3405_v42, %s2389_s28  ;;  %v1015_v7 = vsel %vm2942_vm9, %v2973_v55, 0.0 }
 0x329   :  { %v1648_v6 = vpop.permute.xlu0 %1647  ;;  %1721 = vrot.lane.b32.xlu2 %v2992_v61, %s2388_s4  ;;  %v1584_v18 = vpop.permute.xlu1 %1583  ;;  %v2337_v61 = vunpack.i.l.bf16 %v2780_v47 }
 0x32b   :  { %v3412_v8 = vpop.permute.xlu2 %1599 }
 0x32c   :  { %4217 = vst [vmem:[#allocation16_spill] sm:$0xff] %v3412_v8  ;;  %v1757_v8 = vsel %vm4161_vm4, 0.0, %v2337_v61 }
 0x32f   :  { %1333 = vrot.lane.b32.xlu1 %v1015_v7, %s2395_s3  ;;  %1275 = vrot.lane.b32.xlu0 %v984_v62, %s2390_s30  ;;  %v1773_v62 = vsel %vm4223_vm5, %v1757_v8, %v2342_v53  ;;  %v901_v7 = vld [vmem:[#allocation2 + $0x88] sm:$0xff]  ;;  %v4226_v8 = vsel %vm2913_vm7, %v3060_v58, 0.0 }
 0x331   :  { %v3434_v22 = vpop.permute.xlu0 %1457  ;;  %1525 = vrot.lane.b32.xlu2 %v1093_v59, %s2392_s10  ;;  %v3437_v10 = vpop.permute.xlu1 %1393  ;;  %v1790_v59 = vsel %vm4224_vm3, %v1773_v62, %v3207_v36  ;;  %vm4162_vm3 = vcmask 228352  }
 0x332   :  { %v1806_v53 = vsel %vm4225_vm15, %v1790_v59, %v3139_v20  ;;  %v1052_v20 = vsel %vm2982_vm11, %v3443_v9, 0.0  ;;  %vm4164_vm15 = vcmask 261120  }
 0x333   :  { %v3441_v1 = vpop.permute.xlu2 %1731 }
 0x334   :  { %4222 = vst [vmem:[#allocation18_spill] sm:$0xff] %v3441_v1 }
 0x337   :  { %1221 = vrot.lane.b32.xlu1 %v901_v7, %s2389_s28  ;;  %1653 = vrot.lane.b32.xlu0 %v1169_v56, %s2388_s4  ;;  %v1823_v56 = vsel %vm4160_vm13, %v1806_v53, %v3346_v37  ;;  %vm4227_vm13 = vcmask 64512  }
 0x338   :  { %v1840_v26 = vsel %vm4159_vm14, %v1823_v56, %v3270_v33  ;;  %v2338_v33 = vunpack.i.h.bf16 %v2780_v47  ;;  %vm1890_vm14 = vcmask 293888   ;;  %v1170_v47 = vsel %vm2982_vm11, %v3414_v38, 0.0 }
 0x339   :  { %v1220_v61 = vpop.permute.xlu0 %1219  ;;  %1223 = vrot.lane.b32.xlu2 %v3453_v28, %s2389_s28  ;;  %v1266_v1 = vpop.permute.xlu1 %1265 }
 0x33a   :  { %v3464_v36 = vsel %vm4161_vm4, %v4226_v8, %v1220_v61  ;;  %v2343_v8 = vunpack.i.h.bf16 %v2793_v51 }
 0x33b   :  { %v1282_v62 = vpop.permute.xlu2 %1281 }
 0x33c   :  { %v1783_v48 = vsel %vm4223_vm5, %v3280_v54, %v1282_v62  ;;  %v1857_v54 = vsel %vm4162_vm3, %v1840_v26, %v3181_v25  ;;  %vm4163_vm5 = vcmask 326656   ;;  %v1765_v26 = vsel %vm4161_vm4, 0.0, %v2338_v33  ;;  %v3541_v33 = vld [vmem:[#allocation2 + $0x98] sm:$0xff] }
 0x33d   :  { %v1781_v51 = vsel %vm4227_vm13, %v1765_v26, %v2343_v8  ;;  %vm4228_vm4 = vcmask 97280   ;;  %v950_v26 = vld [vmem:[#allocation2 + $0x91] sm:$0xff] }
 0x33f   :  { %1601 = vrot.lane.b32.xlu1 %v901_v7, %s2391_s9  ;;  %1463 = vrot.lane.b32.xlu0 %v1052_v20, %s2396_s17 }
 0x341   :  { %v3477_v58 = vpop.permute.xlu0 %1535  ;;  %1735 = vrot.lane.b32.xlu2 %v3104_v17, %s2388_s4  ;;  %v1646_v37 = vpop.permute.xlu1 %1645  ;;  %v1858_v17 = vsel %vm4162_vm3, %v3332_v30, %v1584_v18  ;;  %v1798_v18 = vsel %vm4228_vm4, %v1781_v51, %v3307_v4  ;;  %vm4229_vm3 = vmmov %vm4227_vm13  ;;  %vm4232_vm13 = vcmask 326656   ;;  %v1053_v4 = vsel %vm2904_vm6, %v3414_v38, 0.0  ;;  %v3584_v51 = vld [vmem:[#allocation2 + $0x47] sm:$0xff] }
 0x342   :  { %v1874_v59 = vsel %vm4164_vm15, %v1857_v54, %v1646_v37  ;;  %v1875_v25 = vsel %vm4164_vm15, %v1858_v17, %v1648_v6  ;;  %vm4233_vm15 = vcmask 162816  }
 0x343   :  { %v1662_v61 = vpop.permute.xlu2 %1661  ;;  %v1891_v53 = vsel %vm1890_vm14, %v1874_v59, %v3179_v19  ;;  %v1100_v19 = vsel %vm2913_vm7, %v3109_v16, 0.0  ;;  %v1892_v6 = vsel %vm1890_vm14, %v1875_v25, %v3157_v60  ;;  %vm4231_vm7 = vmmov %vm4228_vm4  ;;  %v1023_v60 = vsel %vm2942_vm9, %v3109_v16, 0.0 }
 0x344   :  { %2297 = vmatmul.msk.f32.vlgmr.msrb.gmra.mxu0 %vm4163_vm5, %v1891_v53  ;;  %vm4230_vm5 = vcmask 130048   ;;  %vm4235_vm4 = vcmask 195584  }
 0x345   :  { %v1814_v62 = vsel %vm4230_vm5, %v1798_v18, %v3391_v14  ;;  %v4234_v14 = vsel %vm2934_vm8, %v3088_v34, 0.0  ;;  %vm4238_vm8 = vmmov %vm4232_vm13  ;;  %vm4239_vm5 = vcmask 64512  }
 0x346   :  { %v1831_v54 = vsel %vm4233_vm15, %v1814_v62, %v3329_v23  ;;  %vm4237_vm15 = vcmask 261120   ;;  %v1775_v59 = vsel %vm4239_vm5, %v3315_v39, %v1266_v1 }
 0x347   :  { %1411 = vrot.lane.b32.xlu1 %v901_v7, %s2394_s5  ;;  %1655 = vrot.lane.b32.xlu0 %v1170_v47, %s2388_s4  ;;  %v1848_v23 = vsel %vm4235_vm4, %v1831_v54, %v3343_v21  ;;  %vm4241_vm4 = vcmask 130048  }
 0x349   :  { %v1270_v56 = vpop.permute.xlu0 %1269  ;;  %1539 = vrot.lane.b32.xlu2 %v1100_v19, %s2392_s10  ;;  %v1330_v30 = vpop.permute.xlu1 %1329 }
 0x34a   :  { %v3507_v7 = vsel %vm4229_vm3, %v3398_v52, %v1270_v56  ;;  %vm4236_vm3 = vcmask 228352   ;;  %v1792_v21 = vsel %vm4231_vm7, %v1775_v59, %v1330_v30  ;;  %v1059_v56 = vsel %vm3211_vm0, %v950_v26, 0.0 }
 0x34b   :  { %v1346_v49 = vpop.permute.xlu2 %1345  ;;  %v1808_v39 = vsel %vm4241_vm4, %v1792_v21, %v3437_v10  ;;  %v1094_v10 = vsel %vm2961_vm10, %v3032_v27, 0.0  ;;  %v1095_v30 = vsel %vm2988_vm12, %v3584_v51, 0.0 }
 0x34c   :  { %v3514_v20 = vsel %vm4231_vm7, %v1783_v48, %v1346_v49  ;;  %2298 = vmatmul.msk.f32.gmra.mxu0 %vm4232_vm13, %v1892_v6  ;;  %vm4240_vm13 = vmmov %vm4239_vm5  ;;  %vm4246_vm5 = vcmask 261120   ;;  %v990_v6 = vsel %vm2982_vm11, %v950_v26, 0.0 }
 0x34f   :  { %1663 = vrot.lane.b32.xlu1 %v4234_v14, %s2388_s4  ;;  %1465 = vrot.lane.b32.xlu0 %v1053_v4, %s2396_s17  ;;  %v951_v14 = vld [vmem:[#allocation2 + $0x99] sm:$0xff] }
 0x350   :  { %v1060_v59 = vsel %vm2982_vm11, %v951_v14, 0.0 }
 0x351   :  { %v1650_v52 = vpop.permute.xlu0 %1649  ;;  %1349 = vrot.lane.b32.xlu2 %v1023_v60, %s2395_s3  ;;  %v1598_v48 = vpop.permute.xlu1 %1597  ;;  %v1177_v60 = vsel %vm3211_vm0, %v951_v14, 0.0  ;;  %vm4251_vm0 = vcmask 31744  }
 0x352   :  { %v1865_v38 = vsel %vm4236_vm3, %v1848_v23, %v1598_v48  ;;  %vm4242_vm3 = vmmov %vm4231_vm7  ;;  %vm4247_vm7 = vcmask 326656  }
 0x353   :  { %v1882_v57 = vsel %vm4237_vm15, %v1865_v38, %v1662_v61  ;;  %v3536_v37 = vpop.permute.xlu2 %1719  ;;  %v983_v61 = vsel %vm2904_vm6, %v3443_v9, 0.0  ;;  %v1176_v9 = vsel %vm3167_vm2, %v950_v26, 0.0  ;;  %vm4243_vm15 = vcmask 162816  }
 0x354   :  { %v1899_v34 = vsel %vm1890_vm14, %v1882_v57, %v3273_v15  ;;  %v1825_v47 = vsel %vm4243_vm15, %v1808_v39, %v3434_v22  ;;  %vm4245_vm2 = vcmask 228352   ;;  %v4250_v57 = vsel %vm2988_vm12, %v2998_v63, 0.0 }
 0x355   :  { %2305 = vmatmul.msk.f32.vlgmr.msrb.gmra.mxu3 %vm4238_vm8, %v1899_v34  ;;  %vm4244_vm8 = vcmask 195584   ;;  %v991_v39 = vsel %vm2904_vm6, %v951_v14, 0.0 }
 0x357   :  { %1589 = vrot.lane.b32.xlu1 %v3387_v31, %s2391_s9  ;;  %1225 = vrot.lane.b32.xlu0 %v3541_v33, %s2389_s28 }
 0x359   :  { %v3553_v15 = vpop.permute.xlu0 %1459  ;;  %1273 = vrot.lane.b32.xlu2 %v983_v61, %s2390_s30  ;;  %v1280_v53 = vpop.permute.xlu1 %1279 }
 0x35a   :  { %v1782_v1 = vsel %vm4240_vm13, %v3365_v45, %v1280_v53 }
 0x35b   :  { %v1799_v8 = vsel %vm4242_vm3, %v1782_v1, %v3357_v29  ;;  %v3562_v17 = vpop.permute.xlu2 %1523  ;;  %v1842_v29 = vsel %vm4244_vm8, %v1825_v47, %v3403_v12  ;;  %v4248_v12 = vsel %vm2982_vm11, %v2996_v40, 0.0  ;;  %v1016_v40 = vsel %vm2961_vm10, %v2998_v63, 0.0  ;;  %vm4249_vm3 = vmmov %vm4243_vm15 }
 0x35c   :  { %vm4252_vm15 = vmmov %vm4241_vm4 }
 0x35d   :  { %v1815_v63 = vsel %vm4252_vm15, %v1799_v8, %v3294_v5  ;;  %vm4253_vm8 = vmmov %vm4249_vm3  ;;  %v1102_v8 = vsel %vm2961_vm10, %v3145_v13, 0.0 }
 0x35f   :  { %1399 = vrot.lane.b32.xlu1 %v3387_v31, %s2394_s5  ;;  %1667 = vrot.lane.b32.xlu0 %v1176_v9, %s2388_s4  ;;  %v4256_v9 = vsel %vm2961_vm10, %v2973_v55, 0.0  ;;  %v1025_v55 = vsel %vm2988_vm12, %v3145_v13, 0.0 }
 0x361   :  { %v1474_v45 = vpop.permute.xlu0 %1473  ;;  %1527 = vrot.lane.b32.xlu2 %v1094_v10, %s2392_s10  ;;  %v1586_v46 = vpop.permute.xlu1 %1585 }
 0x362   :  { %v1859_v19 = vsel %vm4245_vm2, %v1842_v29, %v1586_v46  ;;  %vm4254_vm2 = vcmask 195584  }
 0x363   :  { %v3578_v25 = vpop.permute.xlu2 %1733  ;;  %v1876_v22 = vsel %vm4246_vm5, %v1859_v19, %v1650_v52  ;;  %v1101_v52 = vsel %vm2942_vm9, %v3125_v3, 0.0  ;;  %vm4255_vm5 = vcmask 97280  }
 0x364   :  { %v1893_v31 = vsel %vm1890_vm14, %v1876_v22, %v3195_v24 }
 0x365   :  { %2299 = vmatmul.msk.f32.gmra.mxu0 %vm4247_vm7, %v1893_v31  ;;  %vm4257_vm7 = vmmov %vm4251_vm0 }
 0x366   :  { %vm4264_vm15 = vmmov %vm4257_vm7 }
 0x367   :  { %1271 = vrot.lane.b32.xlu1 %v4248_v12, %s2390_s30  ;;  %1477 = vrot.lane.b32.xlu0 %v1059_v56, %s2396_s17 }
 0x369   :  { %v1284_v24 = vpop.permute.xlu0 %1283  ;;  %1529 = vrot.lane.b32.xlu2 %v1095_v30, %s2392_s10  ;;  %v1396_v18 = vpop.permute.xlu1 %1395 }
 0x36a   :  { %v3600_v62 = vsel %vm4240_vm13, %v3464_v36, %v1284_v24  ;;  %vm4258_vm13 = vmmov %vm4241_vm4  ;;  %v994_v24 = vld [vmem:[#allocation2 + $0xa7] sm:$0xff] }
 0x36b   :  { %v3602_v49 = vpop.permute.xlu2 %1537  ;;  %v1103_v50 = vsel %vm2988_vm12, %v994_v24, 0.0 }
 0x36f   :  { %1335 = vrot.lane.b32.xlu1 %v1016_v40, %s2395_s3  ;;  %1287 = vrot.lane.b32.xlu0 %v990_v6, %s2390_s30  ;;  %v4266_v40 = vld [vmem:[#allocation8_spill] sm:$0xff] }
 0x371   :  { %v1652_v54 = vpop.permute.xlu0 %1651  ;;  %1737 = vrot.lane.b32.xlu2 %v3121_v0, %s2388_s4  ;;  %v1332_v4 = vpop.permute.xlu1 %1331 }
 0x372   :  { %v1793_v5 = vsel %vm4255_vm5, %v3372_v41, %v1332_v4  ;;  %v952_v41 = vld [vmem:[#allocation2 + $0xa1] sm:$0xff]  ;;  %v1030_v4 = vld [vmem:[#allocation2 + $0xa9] sm:$0xff]  ;;  %vm4270_vm5 = vcmask 64512  }
 0x373   :  { %v3613_v36 = vpop.permute.xlu2 %1347  ;;  %v1809_v10 = vsel %vm4258_vm13, %v1793_v5, %v1396_v18  ;;  %v1178_v29 = vsel %vm2982_vm11, %v952_v41, 0.0  ;;  %vm4261_vm11 = vcmask 228352   ;;  %v1061_v18 = vsel %vm2904_vm6, %v952_v41, 0.0 }
 0x377   :  { %1603 = vrot.lane.b32.xlu1 %v3453_v28, %s2391_s9  ;;  %1669 = vrot.lane.b32.xlu0 %v1177_v60, %s2388_s4  ;;  %v1179_v60 = vsel %vm2904_vm6, %v1030_v4, 0.0 }
 0x379   :  { %v3623_v23 = vpop.permute.xlu0 %1461  ;;  %1541 = vrot.lane.b32.xlu2 %v1101_v52, %s2392_s10  ;;  %v1410_v0 = vpop.permute.xlu1 %1409 }
 0x37a   :  { %v1816_v48 = vsel %vm4241_vm4, %v3514_v20, %v1410_v0  ;;  %v1024_v20 = vsel %vm2961_vm10, %v3125_v3, 0.0  ;;  %vm4259_vm4 = vmmov %vm4249_vm3 }
 0x37b   :  { %v3629_v2 = vsel %vm4249_vm3, %v1816_v48, %v1474_v45  ;;  %v1210_v38 = vpop.permute.xlu2 %1209  ;;  %v1826_v46 = vsel %vm4259_vm4, %v1809_v10, %v3553_v15  ;;  %vm4260_vm3 = vmmov %vm4254_vm2 }
 0x37c   :  { %v3636_v34 = vsel %vm4251_vm0, %v4250_v57, %v1210_v38  ;;  %v1843_v22 = vsel %vm4260_vm3, %v1826_v46, %v3562_v17  ;;  %vm4262_vm0 = vcmask 261120   ;;  %v1017_v17 = vsel %vm2988_vm12, %v3032_v27, 0.0  ;;  %v4272_v57 = vld [vmem:[#allocation10_spill] sm:$0xff] }
 0x37f   :  { %1413 = vrot.lane.b32.xlu1 %v3453_v28, %s2394_s5  ;;  %1479 = vrot.lane.b32.xlu0 %v1060_v59, %s2396_s17 }
 0x381   :  { %v3646_v21 = vpop.permute.xlu0 %1665  ;;  %1351 = vrot.lane.b32.xlu2 %v1024_v20, %s2395_s3  ;;  %v1472_v61 = vpop.permute.xlu1 %1471  ;;  %v4273_v20 = vld [vmem:[#allocation9_spill] sm:$0xff] }
 0x382   :  { %v1832_v53 = vsel %vm4253_vm8, %v1815_v63, %v1472_v61  ;;  %vm4265_vm8 = vcmask 326656   ;;  %v4274_v63 = vsel %vm2942_vm9, %v4273_v20, 0.0  ;;  %vm4279_vm9 = vcmask 97280  }
 0x383   :  { %v3654_v1 = vsel %vm4254_vm2, %v1832_v53, %v3477_v58  ;;  %v3656_v28 = vpop.permute.xlu2 %1721  ;;  %vm4269_vm2 = vmmov %vm4257_vm7  ;;  %v1801_v10 = vsel %vm4279_vm9, %v3600_v62, %v3613_v36 }
 0x384   :  { %vm4275_vm6 = vmmov %vm4269_vm2 }
 0x385   :  { %vm4281_vm3 = vmmov %vm4279_vm9  ;;  %vm4291_vm9 = vcmask 31744  }
 0x387   :  { %1591 = vrot.lane.b32.xlu1 %v3405_v42, %s2391_s9  ;;  %1289 = vrot.lane.b32.xlu0 %v991_v39, %s2390_s30  ;;  %v1062_v39 = vsel %vm3418_vm1, %v1030_v4, 0.0 }
 0x389   :  { %v3668_v26 = vpop.permute.xlu0 %1475  ;;  %1543 = vrot.lane.b32.xlu2 %v1102_v8, %s2392_s10  ;;  %v1208_v58 = vpop.permute.xlu1 %1207 }
 0x38a   :  { %v3676_v47 = vsel %vm4257_vm7, %v4256_v9, %v1208_v58  ;;  %vm4276_vm7 = vmmov %vm4270_vm5  ;;  %v904_v58 = vld [vmem:[#allocation2 + $0xa0] sm:$0xff] }
 0x38b   :  { %v3679_v45 = vpop.permute.xlu2 %1525  ;;  %v4278_v9 = vld [vmem:[#allocation7_spill] sm:$0xff] }
 0x38f   :  { %1401 = vrot.lane.b32.xlu1 %v3405_v42, %s2394_s5  ;;  %1671 = vrot.lane.b32.xlu0 %v1178_v29, %s2388_s4  ;;  %v4263_v42 = vsel %vm2961_vm10, %v3109_v16, 0.0  ;;  %vm4267_vm10 = vnez %v4266_v40 }
 0x390   :  { %v4268_v6 = vsel %vm4267_vm10, %v3032_v27, 0.0  ;;  %v1018_v14 = vsel %vm4267_vm10, %v3584_v51, 0.0  ;;  %v1026_v52 = vsel %vm4267_vm10, %v994_v24, 0.0  ;;  %v992_v51 = vsel %vm3418_vm1, %v952_v41, 0.0 }
 0x391   :  { %v1286_v19 = vpop.permute.xlu0 %1285  ;;  %1353 = vrot.lane.b32.xlu2 %v1025_v55, %s2395_s3  ;;  %v1588_v32 = vpop.permute.xlu1 %1587  ;;  %v4280_v55 = vld [vmem:[#allocation6_spill] sm:$0xff] }
 0x392   :  { %v1860_v31 = vsel %vm4261_vm11, %v1843_v22, %v1588_v32  ;;  %v4282_v32 = vld [vmem:[#allocation16_spill] sm:$0xff] }
 0x393   :  { %v1224_v56 = vpop.permute.xlu2 %1223  ;;  %v1877_v15 = vsel %vm4262_vm0, %v1860_v31, %v1652_v54  ;;  %v1866_v62 = vsel %vm4261_vm11, %v3654_v1, %v4282_v32 }
 0x394   :  { %v3701_v12 = vsel %vm4264_vm15, %v4263_v42, %v1224_v56  ;;  %v1894_v30 = vsel %vm1890_vm14, %v1877_v15, %v3247_v43  ;;  %vm4283_vm15 = vmmov %vm4258_vm13 }
 0x395   :  { %2300 = vmatmul.msk.f32.gmra.mxu0 %vm4265_vm8, %v1894_v30  ;;  %vm4285_vm8 = vcmask 195584  }
 0x396   :  { %v1850_v42 = vsel %vm4285_vm8, %v3629_v2, %v3602_v49 }
 0x397   :  { %1337 = vrot.lane.b32.xlu1 %v1017_v17, %s2395_s3  ;;  %1481 = vrot.lane.b32.xlu0 %v1061_v18, %s2396_s17  ;;  %v4290_v18 = vsel %vm2988_vm12, %v3125_v3, 0.0  ;;  %v1028_v3 = vld [vmem:[#allocation2 + $0xa8] sm:$0xff] }
 0x399   :  { %v1212_v16 = vpop.permute.xlu0 %1211  ;;  %1545 = vrot.lane.b32.xlu2 %v1103_v50, %s2392_s10  ;;  %v1398_v43 = vpop.permute.xlu1 %1397 }
 0x39a   :  { %v1764_v54 = vsel %vm4269_vm2, %v4268_v6, %v1212_v16  ;;  %vm4286_vm2 = vcmask 326656  }
 0x39b   :  { %v3791_v30 = vpop.permute.xlu2 %1735  ;;  %vm4298_vm12 = vmmov %vm4286_vm2 }
 0x39f   :  { %1339 = vrot.lane.b32.xlu1 %v1018_v14, %s2395_s3  ;;  %1673 = vrot.lane.b32.xlu0 %v1179_v60, %s2388_s4 }
 0x3a1   :  { %v1276_v0 = vpop.permute.xlu0 %1275  ;;  %1355 = vrot.lane.b32.xlu2 %v1026_v52, %s2395_s3  ;;  %v1334_v27 = vpop.permute.xlu1 %1333  ;;  %v2370_v52 = vld [vmem:[#allocation2 + $0x49] sm:$0xff] }
 0x3a2   :  { %v3732_v48 = vsel %vm4270_vm5, %v1764_v54, %v1276_v0  ;;  %vm4287_vm5 = vmmov %vm4261_vm11  ;;  %v1054_v0 = vsel %vm3418_vm1, %v2370_v52, 0.0  ;;  %vm4304_vm1 = vcmask 97280  }
 0x3a3   :  { %vm4296_vm11 = vmmov %vm4286_vm2 }
 0x3a7   :  { %1605 = vrot.lane.b32.xlu1 %v3541_v33, %s2391_s9  ;;  %1291 = vrot.lane.b32.xlu0 %v992_v51, %s2390_s30 }
 0x3a9   :  { %v1654_v35 = vpop.permute.xlu0 %1653  ;;  %1739 = vrot.lane.b32.xlu2 %v4272_v57, %s2388_s4  ;;  %v1222_v59 = vpop.permute.xlu1 %1221 }
 0x3aa   :  { %v1769_v61 = vsel %vm4275_vm6, %v4274_v63, %v1222_v59  ;;  %vm4288_vm6 = vmmov %vm4259_vm4 }
 0x3ab   :  { %v3747_v53 = vsel %vm4276_vm7, %v1769_v61, %v1286_v19  ;;  %v1794_v19 = vsel %vm4281_vm3, %v3507_v7, %v1334_v27  ;;  %vm4289_vm7 = vmmov %vm4262_vm0  ;;  %v4302_v61 = vld [vmem:[#allocation18_spill] sm:$0xff] }
 0x3ac   :  { %v1810_v56 = vsel %vm4283_vm15, %v1794_v19, %v1398_v43  ;;  %vm4295_vm3 = vmmov %vm4262_vm0 }
 0x3ad   :  { %v1827_v1 = vsel %vm4288_vm6, %v1810_v56, %v3623_v23  ;;  %v4294_v23 = vld [vmem:[#allocation14_spill] sm:$0xff]  ;;  %vm4305_vm6 = vcmask 130048  }
 0x3af   :  { %1415 = vrot.lane.b32.xlu1 %v3541_v33, %s2394_s5  ;;  %1483 = vrot.lane.b32.xlu0 %v1062_v39, %s2396_s17 }
 0x3b1   :  { %v3754_v5 = vpop.permute.xlu0 %1463  ;;  %v1602_v8 = vpop.permute.xlu1 %1601  ;;  %1659 = vrot.lane.b32.xlu2 %v4277_v44, %s2388_s4 }
 0x3b2   :  { %v1867_v7 = vsel %vm4287_vm5, %v1850_v42, %v1602_v8 }
 0x3b3   :  { %v1884_v17 = vsel %vm4289_vm7, %v1867_v7, %v3646_v21  ;;  %v4297_v21 = vld [vmem:[#allocation15_spill] sm:$0xff]  ;;  %vm4306_vm7 = vcmask 162816  }
 0x3b4   :  { %v1901_v43 = vsel %vm1890_vm14, %v1884_v17, %v4294_v23 }
 0x3b7   :  { %1227 = vrot.lane.b32.xlu1 %v904_v58, %s2389_s28  ;;  %1403 = vrot.lane.b32.xlu0 %v4278_v9, %s2394_s5 }
 0x3b9   :  { %v3764_v41 = vpop.permute.xlu0 %1655  ;;  %v1412_v33 = vpop.permute.xlu1 %1411 }
 0x3ba   :  { %v1817_v29 = vsel %vm4258_vm13, %v1801_v10, %v1412_v33  ;;  %vm4292_vm13 = vmmov %vm4285_vm8 }
 0x3bb   :  { %v1834_v46 = vsel %vm4259_vm4, %v1817_v29, %v3668_v26  ;;  %v4284_v26 = vld [vmem:[#allocation12_spill] sm:$0xff]  ;;  %v1844_v2 = vsel %vm4292_vm13, %v1827_v1, %v3679_v45  ;;  %vm4293_vm4 = vmmov %vm4287_vm5  ;;  %v1540_v45 = vpop.permute.xlu2 %1539  ;;  %vm4303_vm5 = vcmask 64512  }
 0x3bc   :  { %vm4300_vm15 = vmmov %vm4293_vm4 }
 0x3bd   :  { %vm4308_vm13 = vmmov %vm4293_vm4 }
 0x3bf   :  { %1607 = vrot.lane.b32.xlu1 %v904_v58, %s2391_s9  ;;  %1723 = vrot.lane.b32.xlu0 %v4280_v55, %s2388_s4 }
 0x3c1   :  { %v3774_v22 = vpop.permute.xlu0 %1465  ;;  %v1664_v36 = vpop.permute.xlu1 %1663 }
 0x3c2   :  { %v1883_v31 = vsel %vm4262_vm0, %v1866_v62, %v1664_v36  ;;  %vm4299_vm0 = vmmov %vm4285_vm8 }
 0x3c3   :  { %v1900_v15 = vsel %vm1890_vm14, %v1883_v31, %v4284_v26  ;;  %v1350_v14 = vpop.permute.xlu2 %1349  ;;  %v1851_v57 = vsel %vm4299_vm0, %v1834_v46, %v1540_v45  ;;  %vm4301_vm8 = vmmov %vm4295_vm3 }
 0x3c4   :  { %2306 = vmatmul.msk.f32.gmra.mxu3 %vm4286_vm2, %v1900_v15 }
 0x3c7   :  { %1417 = vrot.lane.b32.xlu1 %v904_v58, %s2394_s5 }
 0x3c9   :  { %v1226_v24 = vpop.permute.xlu0 %1225  ;;  %v1590_v50 = vpop.permute.xlu1 %1589 }
 0x3ca   :  { %v3800_v49 = vsel %vm4291_vm9, %v4290_v18, %v1226_v24  ;;  %v1861_v16 = vsel %vm4293_vm4, %v1844_v2, %v1590_v50  ;;  %vm4307_vm9 = vmmov %vm4299_vm0  ;;  %v4318_v18 = vld [vmem:[#allocation11_spill] sm:$0xff] }
 0x3cb   :  { %v1878_v6 = vsel %vm4295_vm3, %v1861_v16, %v1654_v35  ;;  %v1274_v51 = vpop.permute.xlu2 %1273  ;;  %vm4309_vm4 = vmmov %vm4295_vm3 }
 0x3cc   :  { %2307 = vmatmul.msk.f32.gmra.mxu3 %vm4296_vm11, %v1901_v43  ;;  %v1895_v11 = vsel %vm1890_vm14, %v1878_v6, %v4297_v21  ;;  %vm4310_vm3 = vmmov %vm4286_vm2 }
 0x3cd   :  { %2301 = vmatmul.msk.f32.gmra.mxu0 %vm4298_vm12, %v1895_v11  ;;  %vm4311_vm11 = vmmov %vm4303_vm5 }
 0x3ce   :  { %vm4312_vm12 = vmmov %vm4304_vm1 }
 0x3cf   :  { %1609 = vrot.lane.b32.xlu1 %v1028_v3, %s2391_s9  ;;  %vm4313_vm0 = vmmov %vm4305_vm6 }
 0x3d1   :  { %v1400_v54 = vpop.permute.xlu1 %1399  ;;  %v1668_v60 = vpop.permute.xlu0 %1667 }
 0x3d3   :  { %v1528_v8 = vpop.permute.xlu2 %1527 }
 0x3d7   :  { %1419 = vrot.lane.b32.xlu1 %v1028_v3, %s2394_s5 }
 0x3d9   :  { %v1272_v4 = vpop.permute.xlu1 %1271  ;;  %v1478_v35 = vpop.permute.xlu0 %1477 }
 0x3da   :  { %v1778_v38 = vsel %vm4303_vm5, %v3676_v47, %v1272_v4  ;;  %vm4319_vm5 = vmmov %vm4309_vm4 }
 0x3db   :  { %v1530_v55 = vpop.permute.xlu2 %1529 }
 0x3df   :  { %1467 = vrot.lane.b32.xlu1 %v1054_v0, %s2396_s17 }
 0x3e1   :  { %v1336_v27 = vpop.permute.xlu1 %1335  ;;  %v1288_v58 = vpop.permute.xlu0 %1287 }
 0x3e2   :  { %v1795_v44 = vsel %vm4304_vm1, %v1778_v38, %v1336_v27  ;;  %vm4320_vm1 = vmmov %vm4310_vm3 }
 0x3e3   :  { %v1811_v10 = vsel %vm4305_vm6, %v1795_v44, %v1400_v54  ;;  %v1738_v31 = vpop.permute.xlu2 %1737  ;;  %vm4321_vm6 = vmmov %vm4312_vm12 }
 0x3e4   :  { %v1828_v33 = vsel %vm4306_vm7, %v1811_v10, %v3754_v5  ;;  %v1779_v5 = vsel %vm4311_vm11, %v3636_v34, %v1274_v51  ;;  %v1802_v16 = vsel %vm4321_vm6, %v3747_v53, %v1350_v14  ;;  %vm4327_vm11 = vmmov %vm4320_vm1 }
 0x3e5   :  { %v1845_v29 = vsel %vm4307_vm9, %v1828_v33, %v1528_v8 }
 0x3e9   :  { %v1604_v59 = vpop.permute.xlu1 %1603  ;;  %v1670_v32 = vpop.permute.xlu0 %1669 }
 0x3ea   :  { %v1868_v20 = vsel %vm4300_vm15, %v1851_v57, %v1604_v59  ;;  %vm4314_vm15 = vmmov %vm4306_vm7 }
 0x3eb   :  { %v1885_v63 = vsel %vm4301_vm8, %v1868_v20, %v1668_v60  ;;  %vm4315_vm8 = vmmov %vm4307_vm9  ;;  %v1542_v1 = vpop.permute.xlu2 %1541 }
 0x3ec   :  { %v1902_v39 = vsel %vm1890_vm14, %v1885_v63, %v4302_v61  ;;  %vm4322_vm7 = vmmov %vm4313_vm0 }
 0x3ed   :  { %2308 = vmatmul.msk.f32.gmra.mxu3 %vm4286_vm2, %v1902_v39  ;;  %vm4317_vm2 = vmmov %vm4308_vm13 }
 0x3ee   :  { %vm4323_vm9 = vmmov %vm4314_vm15 }
 0x3f1   :  { %v1414_v9 = vpop.permute.xlu1 %1413  ;;  %v1480_v56 = vpop.permute.xlu0 %1479 }
 0x3f3   :  { %v1352_v43 = vpop.permute.xlu2 %1351 }
 0x3f9   :  { %v1592_v46 = vpop.permute.xlu1 %1591  ;;  %v1290_v17 = vpop.permute.xlu0 %1289 }
 0x3fa   :  { %v1862_v19 = vsel %vm4308_vm13, %v1845_v29, %v1592_v46  ;;  %vm4324_vm13 = vmmov %vm4315_vm8  ;;  %v4342_v46 = vsel %vm4267_vm10, %v3145_v13, 0.0 }
 0x3fb   :  { %v1879_v47 = vsel %vm4309_vm4, %v1862_v19, %v3764_v41  ;;  %vm4325_vm4 = vmmov %vm4317_vm2  ;;  %v1544_v53 = vpop.permute.xlu2 %1543 }
 0x3fc   :  { %v1896_v62 = vsel %vm1890_vm14, %v1879_v47, %v3536_v37  ;;  %v4316_v37 = vld [vmem:[#allocation13_spill] sm:$0xff] }
 0x3fd   :  { %2302 = vmatmul.msk.f32.gmra.mxu0 %vm4310_vm3, %v1896_v62  ;;  %vm4326_vm3 = vmmov %vm4319_vm5 }
 0x401   :  { %v1402_v36 = vpop.permute.xlu1 %1401  ;;  %v1672_v6 = vpop.permute.xlu0 %1671 }
 0x403   :  { %v1354_v27 = vpop.permute.xlu2 %1353 }
 0x409   :  { %v1338_v26 = vpop.permute.xlu1 %1337  ;;  %v1482_v4 = vpop.permute.xlu0 %1481 }
 0x40a   :  { %v1796_v15 = vsel %vm4312_vm12, %v1779_v5, %v1338_v26  ;;  %vm4328_vm12 = vcmask 64512   ;;  %v4350_v26 = vld [vmem:[#allocation4_spill] sm:$0xff] }
 0x40b   :  { %v1812_v42 = vsel %vm4313_vm0, %v1796_v15, %v1402_v36  ;;  %v1786_v14 = vsel %vm4328_vm12, %v3701_v12, %v1288_v58  ;;  %vm4329_vm0 = vmmov %vm4321_vm6  ;;  %v1546_v12 = vpop.permute.xlu2 %1545  ;;  %v4348_v36 = vld [vmem:[#allocation3_spill] sm:$0xff]  ;;  %v2352_v13 = vunpack.i.l.bf16 %v4350_v26 }
 0x40c   :  { %v1829_v7 = vsel %vm4314_vm15, %v1812_v42, %v3774_v22  ;;  %v1818_v22 = vsel %vm4322_vm7, %v1802_v16, %v1414_v9  ;;  %v1803_v52 = vsel %vm4329_vm0, %v1786_v14, %v1352_v43  ;;  %vm4330_vm15 = vmmov %vm4322_vm7 }
 0x40d   :  { %v1846_v41 = vsel %vm4315_vm8, %v1829_v7, %v1530_v55  ;;  %v1835_v23 = vsel %vm4323_vm9, %v1818_v22, %v1478_v35  ;;  %vm4331_vm8 = vmmov %vm4323_vm9 }
 0x40e   :  { %v1863_v24 = vsel %vm4317_vm2, %v1846_v41, %v4316_v37  ;;  %v1852_v21 = vsel %vm4324_vm13, %v1835_v23, %v1542_v1  ;;  %vm4332_vm2 = vmmov %vm4324_vm13  ;;  %v4354_v41 = vld [vmem:[#allocation5_spill] sm:$0xff] }
 0x40f   :  { %v1880_v2 = vsel %vm4319_vm5, %v1863_v24, %v4318_v18  ;;  %vm4333_vm5 = vmmov %vm4325_vm4 }
 0x410   :  { %v1897_v34 = vsel %vm1890_vm14, %v1880_v2, %v3656_v28  ;;  %vm4335_vm6 = vmmov %vm4327_vm11 }
 0x411   :  { %2303 = vmatmul.msk.f32.gmra.mxu0 %vm4320_vm1, %v1897_v34  ;;  %v1340_v50 = vpop.permute.xlu1 %1339  ;;  %v1674_v51 = vpop.permute.xlu0 %1673  ;;  %vm4334_vm1 = vmmov %vm4326_vm3  ;;  %v2353_v34 = vunpack.i.h.bf16 %v4350_v26 }
 0x412   :  { %vm4336_vm7 = vmmov %vm4328_vm12  ;;  %vm4343_vm12 = vcmask 31744  }
 0x413   :  { %v1787_v61 = vsel %vm4336_vm7, %v3800_v49, %v1290_v17  ;;  %vm4337_vm9 = vmmov %vm4329_vm0  ;;  %v1356_v9 = vpop.permute.xlu2 %1355  ;;  %v2348_v17 = vunpack.i.h.bf16 %v4348_v36 }
 0x414   :  { %v1804_v8 = vsel %vm4337_vm9, %v1787_v61, %v1354_v27  ;;  %vm4338_vm13 = vmmov %vm4330_vm15 }
 0x415   :  { %vm4344_vm0 = vmmov %vm4334_vm1 }
 0x419   :  { %v1606_v11 = vpop.permute.xlu1 %1605  ;;  %v1292_v39 = vpop.permute.xlu0 %1291 }
 0x41a   :  { %v1869_v3 = vsel %vm4325_vm4, %v1852_v21, %v1606_v11  ;;  %vm4339_vm4 = vmmov %vm4331_vm8  ;;  %v1982_v11 = vpop.f32.mrf.mxu0 }
 0x41b   :  { %v1886_v54 = vsel %vm4326_vm3, %v1869_v3, %v1670_v32  ;;  %vm4340_vm3 = vmmov %vm4332_vm2  ;;  %v1740_v5 = vpop.permute.xlu2 %1739 }
 0x41c   :  { %v1903_v28 = vsel %vm1890_vm14, %v1886_v54, %v3578_v25  ;;  %vm4351_vm10 = vmmov %vm4339_vm4 }
 0x41d   :  { %2309 = vmatmul.msk.f32.gmra.mxu3 %vm4327_vm11, %v1903_v28  ;;  %vm4341_vm11 = vmmov %vm4333_vm5 }
 0x421   :  { %v1416_v45 = vpop.permute.xlu1 %1415  ;;  %v1484_v10 = vpop.permute.xlu0 %1483 }
 0x422   :  { %v1819_v0 = vsel %vm4330_vm15, %v1803_v52, %v1416_v45  ;;  %vm4345_vm15 = vmmov %vm4335_vm6  ;;  %v1985_v54 = vpop.f32.mrf.mxu0  ;;  %v2355_v52 = vld [vmem:[%s4140_s7] ss:$0 sm:$0xff]  ;;  %s2398_s7 = smov 112  }
 0x423   :  { %v1836_v35 = vsel %vm4331_vm8, %v1819_v0, %v1480_v56  ;;  %vm4346_vm8 = vmmov %vm4336_vm7  ;;  %v2347_v56 = vunpack.i.l.bf16 %v4348_v36  ;;  %v1660_v22 = vpop.permute.xlu2 %1659 }
 0x424   :  { %v1853_v57 = vsel %vm4332_vm2, %v1836_v35, %v1544_v53  ;;  %vm4347_vm2 = vmmov %vm4337_vm9  ;;  %v3914_v35 = vadd.f32 %v2355_v52, %v1985_v54 }
 0x425   :  { %vm4355_vm7 = vmmov %vm4344_vm0 }
 0x426   :  { %vm4356_vm9 = vmmov %vm4347_vm2 }
 0x427   :  { %v1797_v24 = vsel %vm4356_vm9, %v3732_v48, %v1340_v50  ;;  %v2006_v50 = vpop.f32.mrf.mxu3  ;;  %vm4371_vm9 = vmmov %vm4344_vm0 }
 0x429   :  { %v1228_v60 = vpop.permute.xlu1 %1227  ;;  %v1404_v15 = vpop.permute.xlu0 %1403 }
 0x42a   :  { %v1772_v49 = vsel %vm4343_vm12, %v4342_v46, %v1228_v60  ;;  %v1988_v45 = vpop.f32.mrf.mxu0 }
 0x42b   :  { %v1788_v32 = vsel %vm4346_vm8, %v1772_v49, %v1292_v39  ;;  %vm4364_vm8 = vmmov %vm4344_vm0 }
 0x42c   :  { %v1805_v47 = vsel %vm4347_vm2, %v1788_v32, %v1356_v9  ;;  %v2031_v61 = vsel %vm4364_vm8, %v3914_v35, 0.0  ;;  %vm4365_vm2 = vmmov %vm4344_vm0  ;;  %vm2085_vm8 = vcmask 254976  }
 0x431   :  { %v1608_v25 = vpop.permute.xlu1 %1607 }
 0x432   :  { %v1870_v59 = vsel %vm4333_vm5, %v1853_v57, %v1608_v25  ;;  %vm4349_vm5 = vmmov %vm4338_vm13  ;;  %v3916_v57 = vadd.f32 %v2355_v52, %v2006_v50 }
 0x433   :  { %v1887_v20 = vsel %vm4334_vm1, %v1870_v59, %v1672_v6  ;;  %vm4352_vm1 = vmmov %vm4340_vm3  ;;  %v1724_v6 = vpop.permute.xlu0 %1723  ;;  %v3920_v59 = vadd.f32 %v2355_v52, %v1982_v11 }
 0x434   :  { %v1904_v63 = vsel %vm1890_vm14, %v1887_v20, %v3791_v30  ;;  %v3922_v20 = vadd.f32 %v2355_v52, %v1988_v45 }
 0x435   :  { %2310 = vmatmul.msk.f32.gmra.mxu3 %vm4335_vm6, %v1904_v63  ;;  %vm4353_vm6 = vmmov %vm4341_vm11 }
 0x436   :  { %vm4361_vm12 = vmmov %vm4353_vm6 }
 0x439   :  { %v1418_v38 = vpop.permute.xlu1 %1417 }
 0x43a   :  { %v1820_v44 = vsel %vm4338_vm13, %v1804_v8, %v1418_v38  ;;  %vm4357_vm13 = vmmov %vm4345_vm15  ;;  %v2397_v38 = vmov 64.0   ;;  %v2051_v8 = vsel %vm4365_vm2, %v3916_v57, 0.0  ;;  %vm4378_vm2 = vcmask 1041409  }
 0x43b   :  { %v1837_v58 = vsel %vm4339_vm4, %v1820_v44, %v1482_v4  ;;  %vm4358_vm4 = vmmov %vm4349_vm5  ;;  %v1991_v4 = vpop.f32.mrf.mxu0  ;;  %2360 = vrcp.f32 %v2397_v38 }
 0x43c   :  { %v1854_v33 = vsel %vm4340_vm3, %v1837_v58, %v1546_v12  ;;  %v1813_v18 = vsel %vm4358_vm4, %v1797_v24, %v1404_v15  ;;  %vm4359_vm3 = vmmov %vm4351_vm10  ;;  %v3930_v39 = vadd.f32 %v2355_v52, %v1991_v4 }
 0x43d   :  { %vm4373_vm4 = vmmov %vm4344_vm0 }
 0x441   :  { %v1610_v29 = vpop.permute.xlu1 %1609 }
 0x442   :  { %v1871_v30 = vsel %vm4341_vm11, %v1854_v33, %v1610_v29  ;;  %vm4360_vm11 = vmmov %vm4352_vm1 }
 0x443   :  { %v1888_v55 = vsel %vm4344_vm0, %v1871_v30, %v1674_v51 }
 0x444   :  { %v1905_v19 = vsel %vm1890_vm14, %v1888_v55, %v1738_v31 }
 0x445   :  { %2311 = vmatmul.msk.f32.gmra.mxu3 %vm4345_vm15, %v1905_v19  ;;  %vm4362_vm15 = vmmov %vm4357_vm13 }
 0x447   :  { %v2009_v3 = vpop.f32.mrf.mxu3 }
 0x448   :  { %v3912_v27 = vadd.f32 %v2355_v52, %v2009_v3 }
 0x449   :  { %v1420_v62 = vpop.permute.xlu1 %1419 }
 0x44a   :  { %v1821_v40 = vsel %vm4349_vm5, %v1805_v47, %v1420_v62  ;;  %v1994_v60 = vpop.f32.mrf.mxu0  ;;  %vm4366_vm5 = vmmov %vm4344_vm0 }
 0x44b   :  { %v1838_v42 = vsel %vm4351_vm10, %v1821_v40, %v1484_v10  ;;  %vm4367_vm10 = vmmov %vm4344_vm0  ;;  %v3942_v29 = vadd.f32 %v2355_v52, %v1994_v60  ;;  %v2361_v40 = vpop.eup %2360 }
 0x44c   :  { %v1855_v7 = vsel %vm4352_vm1, %v1838_v42, %v2347_v56  ;;  %v2030_v9 = vsel %vm4367_vm10, %v3920_v59, 0.0  ;;  %vm4368_vm1 = vmmov %vm4344_vm0  ;;  %v2073_v24 = vmul.f32 64.0, %v2361_v40 }
 0x44d   :  { %v1872_v31 = vsel %vm4353_vm6, %v1855_v7, %v2352_v13  ;;  %v2033_v10 = vsel %vm4368_vm1, %v3922_v20, 0.0  ;;  %v2032_v46 = vadd.f32 %v2031_v61, %v2030_v9  ;;  %vm4369_vm6 = vmmov %vm4344_vm0 }
 0x44e   :  { %v1889_v1 = vsel %vm4355_vm7, %v1872_v31, %v4354_v41  ;;  %vm4370_vm7 = vmmov %vm4344_vm0 }
 0x44f   :  { %v1906_v37 = vsel %vm1890_vm14, %v1889_v1, %v1740_v5  ;;  %v2012_v28 = vpop.f32.mrf.mxu3  ;;  %v2035_v32 = vsel %vm4370_vm7, %v3930_v39, 0.0  ;;  %v2034_v36 = vadd.f32 %v2033_v10, %v2032_v46 }
 0x450   :  { %2312 = vmatmul.msk.f32.gmra.mxu3 %vm4357_vm13, %v1906_v37  ;;  %v3918_v25 = vadd.f32 %v2355_v52, %v2012_v28  ;;  %vm4372_vm13 = vmmov %vm4344_vm0 }
 0x451   :  { %v1468_v2 = vpop.permute.xlu1 %1467  ;;  %v2037_v26 = vsel %vm4372_vm13, %v3942_v29, 0.0  ;;  %v2036_v42 = vadd.f32 %v2035_v32, %v2034_v36 }
 0x452   :  { %v1830_v16 = vsel %vm4359_vm3, %v1813_v18, %v1468_v2  ;;  %v2054_v44 = vsel %vm4366_vm5, %v3918_v25, 0.0  ;;  %vm4374_vm3 = vmmov %vm4344_vm0 }
 0x453   :  { %v1847_v23 = vsel %vm4360_vm11, %v1830_v16, %v2348_v17  ;;  %v2038_v1 = vadd.f32 %v2037_v26, %v2036_v42  ;;  %vm4375_vm11 = vmmov %vm4344_vm0 }
 0x454   :  { %v1864_v43 = vsel %vm4361_vm12, %v1847_v23, %v2353_v34  ;;  %vm4376_vm12 = vmmov %vm4344_vm0 }
 0x455   :  { %v1881_v21 = vsel %vm4344_vm0, %v1864_v43, %v1660_v22  ;;  %vm4379_vm5 = vmmov %vm4378_vm2 }
 0x456   :  { %v1898_v48 = vsel %vm1890_vm14, %v1881_v21, %v1724_v6  ;;  %vm4363_vm14 = vmmov %vm4344_vm0 }
 0x457   :  { %2304 = vmatmul.msk.f32.gmra.mxu0 %vm4362_vm15, %v1898_v48  ;;  %v2052_v63 = vsel %vm4363_vm14, %v3912_v27, 0.0  ;;  %v2074_v48 = vsub.f32 1.0, %v2073_v24  ;;  %vm4377_vm15 = vmmov %vm4344_vm0  ;;  %vm2077_vm14 = vweird.f32 %v2361_v40 }
 0x458   :  { %v2053_v33 = vadd.f32 %v2052_v63, %v2051_v8 }
 0x459   :  { %v2075_v45 = vmul.f32 %v2361_v40, %v2074_v48 }
 0x45a   :  { %v2055_v47 = vadd.f32 %v2054_v44, %v2053_v33 }
 0x470   :  { %v2015_v53 = vpop.f32.mrf.mxu3 }
 0x471   :  { %v3926_v12 = vadd.f32 %v2355_v52, %v2015_v53 }
 0x473   :  { %v2056_v49 = vsel %vm4369_vm6, %v3926_v12, 0.0 }
 0x474   :  { %v2057_v13 = vadd.f32 %v2056_v49, %v2055_v47 }
 0x47a   :  { %v1997_v51 = vpop.f32.mrf.mxu0 }
 0x47b   :  { %v3950_v62 = vadd.f32 %v2355_v52, %v1997_v51 }
 0x47d   :  { %v2039_v31 = vsel %vm4374_vm3, %v3950_v62, 0.0 }
 0x47e   :  { %v2040_v34 = vadd.f32 %v2039_v31, %v2038_v1 }
 0x48e   :  { %v2000_v55 = vpop.f32.mrf.mxu0 }
 0x48f   :  { %v3958_v15 = vadd.f32 %v2355_v52, %v2000_v55 }
 0x491   :  { %v2041_v17 = vsel %vm4376_vm12, %v3958_v15, 0.0 }
 0x492   :  { %v2042_v6 = vadd.f32 %v2041_v17, %v2040_v34 }
 0x4a0   :  { %v2018_v14 = vpop.f32.mrf.mxu3 }
 0x4a1   :  { %v3936_v58 = vadd.f32 %v2355_v52, %v2018_v14 }
 0x4a3   :  { %v2058_v56 = vsel %vm4371_vm9, %v3936_v58, 0.0 }
 0x4a4   :  { %v2059_v41 = vadd.f32 %v2058_v56, %v2057_v13 }
 0x4b8   :  { %v2021_v0 = vpop.f32.mrf.mxu3 }
 0x4b9   :  { %v3946_v19 = vadd.f32 %v2355_v52, %v2021_v0  ;;  %v2076_v0 = vadd.f32 %v2361_v40, %v2075_v45 }
 0x4bb   :  { %v2060_v7 = vsel %vm4373_vm4, %v3946_v19, 0.0  ;;  %v2078_v38 = vsel %vm2077_vm14, %v2361_v40, %v2076_v0 }
 0x4bc   :  { %v2061_v18 = vadd.f32 %v2060_v7, %v2059_v41 }
 0x4c8   :  { %v2024_v30 = vpop.f32.mrf.mxu3 }
 0x4c9   :  { %v3954_v5 = vadd.f32 %v2355_v52, %v2024_v30 }
 0x4cb   :  { %v2062_v37 = vsel %vm4375_vm11, %v3954_v5, 0.0  ;;  %vm4380_vm11 = vcmask 130048  }
 0x4cc   :  { %v2063_v23 = vadd.f32 %v2062_v37, %v2061_v18  ;;  %vm4381_vm12 = vmmov %vm4380_vm11 }
 0x4d3   :  { %v2027_v2 = vpop.f32.mrf.mxu3 }
 0x4d4   :  { %v3968_v16 = vadd.f32 %v2355_v52, %v2027_v2  ;;  %v2003_v22 = vpop.f32.mrf.mxu0 }
 0x4d5   :  { %v3970_v43 = vadd.f32 %v2355_v52, %v2003_v22 }
 0x4d6   :  { %v2064_v21 = vsel %vm4344_vm0, %v3968_v16, 0.0  ;;  %vm4382_vm0 = vmmov %vm4380_vm11 }
 0x4d7   :  { %v2065_v50 = vadd.f32 %v2064_v21, %v2063_v23  ;;  %v2043_v11 = vsel %vm4377_vm15, %v3970_v43, 0.0  ;;  %vm4383_vm15 = vmmov %vm4382_vm0 }
 0x4d8   :  { %v2044_v3 = vadd.f32 %v2043_v11, %v2042_v6  ;;  %vm4384_vm14 = vmmov %vm4382_vm0 }
 0x4d9   :  { %v2066_v54 = vrot.slane %v2065_v50, 4 }
 0x4da   :  { %v2045_v28 = vrot.slane %v2044_v3, 4 }
 0x4db   :  { %v2067_v53 = vadd.f32 %v2066_v54, %v2065_v50 }
 0x4dc   :  { %v2046_v4 = vadd.f32 %v2045_v28, %v2044_v3 }
 0x4dd   :  { %v2068_v14 = vrot.slane %v2067_v53, 2 }
 0x4de   :  { %v2047_v60 = vrot.slane %v2046_v4, 2 }
 0x4df   :  { %v2069_v52 = vadd.f32 %v2068_v14, %v2067_v53 }
 0x4e0   :  { %v2048_v51 = vadd.f32 %v2047_v60, %v2046_v4 }
 0x4e1   :  { %v2070_v63 = vrot.slane %v2069_v52, 1 }
 0x4e2   :  { %v2049_v61 = vrot.slane %v2048_v51, 1 }
 0x4e3   :  { %v2071_v8 = vadd.f32 %v2070_v63, %v2069_v52 }
 0x4e4   :  { %v2050_v44 = vadd.f32 %v2049_v61, %v2048_v51 }
 0x4e5   :  { %v2080_v9 = vmul.f32 %v2078_v38, %v2071_v8 }
 0x4e6   :  { %v2079_v10 = vmul.f32 %v2078_v38, %v2050_v44 }
 0x4e8   :  { %v2083_v33 = vsel %vm4378_vm2, %v2080_v9, %v2079_v10  ;;  %vm4386_vm2 = vmmov %vm4382_vm0 }
 0x4e9   :  { %v2086_v30 = vsel %vm2085_vm8, %v2083_v33, -inf }
 0x4ea   :  { %2087 = vmax.xlane.f32.xlu1 %v2086_v30  ;;  %v2373_v30 = vld [vmem:[%s4133_s0 + $0x71] sm:$0xff] }
 0x55d   :  { %v2088_v46 = vpop.xlane.xlu1 %2087 }
 0x55e   :  { %v2090_v49 = vrot.slane %v2088_v46, 1  ;;  %v2093_v55 = vsub.f32 %v2079_v10, %v2088_v46 }
 0x560   :  { %v2094_v32 = vsub.f32 %v2080_v9, %v2090_v49  ;;  %v2095_v47 = vmul.f32 1.442695, %v2093_v55 }
 0x562   :  { %v2097_v36 = vmul.f32 1.442695, %v2094_v32 }
 0x564   :  { %2362 = vpow2.f32 %v2097_v36  ;;  %v2374_v36 = vld [vmem:[%s4133_s0 + $0x31] sm:$0xff] }
 0x565   :  { %2364 = vpow2.f32 %v2095_v47 }
 0x56a   :  { %v2363_v56 = vpop.eup %2362 }
 0x56b   :  { %v2101_v40 = vrot.slane %v2363_v56, 7  ;;  %v2365_v26 = vpop.eup %2364 }
 0x56d   :  { %v2102_v13 = vsel %vm4379_vm5, %v2101_v40, %v2365_v26  ;;  %v2375_v40 = vld [vmem:[%s4133_s0 + $0x1] sm:$0xff]  ;;  %vm4387_vm5 = vmmov %vm4382_vm0 }
 0x56e   :  { %v2104_v42 = vsel %vm2085_vm8, %v2102_v13, 0.0  ;;  %vm4385_vm8 = vmmov %vm4382_vm0 }
 0x56f   :  { %2105 = vadd.xlane.f32.xlu2 %v2104_v42 }
 0x5e2   :  { %v2106_v7 = vpop.xlane.xlu2 %2105 }
 0x5e3   :  { %v2108_v31 = vrot.slane %v2106_v7, 1  ;;  %2366 = vrcp.f32 %v2106_v7  ;;  %v2122_v18 = vand.u32 2147483648, %v2106_v7  ;;  %v2120_v34 = vand.u32 2147483647, %v2106_v7 }
 0x5e4   :  { %vm2116_vm1 = vweird.f32 %v2106_v7 }
 0x5e5   :  { %2368 = vrcp.f32 %v2108_v31  ;;  %v2137_v23 = vand.u32 2147483648, %v2108_v31  ;;  %v2135_v48 = vand.u32 2147483647, %v2108_v31  ;;  %v2123_v50 = vor.u32 1.1754944e-38, %v2122_v18 }
 0x5e6   :  { %vm2121_vm9 = vcmp.eq.f32.partialorder %v2120_v34, 8.507059e+37  ;;  %vm2131_vm13 = vweird.f32 %v2108_v31 }
 0x5e7   :  { %v2138_v28 = vor.u32 1.1754944e-38, %v2137_v23  ;;  %vm2136_vm3 = vcmp.eq.f32.partialorder %v2135_v48, 8.507059e+37 }
 0x5e9   :  { %v2367_v41 = vpop.eup %2366 }
 0x5ea   :  { %v2112_v1 = vmul.f32 %v2367_v41, %v2106_v7  ;;  %vm2117_vm10 = vweird.f32 %v2367_v41 }
 0x5eb   :  { %v2369_v37 = vpop.eup %2368  ;;  %vm2118_vm7 = vmor %vm2116_vm1, %vm2117_vm10 }
 0x5ec   :  { %v2113_v24 = vsub.f32 1.0, %v2112_v1  ;;  %v2127_v17 = vmul.f32 %v2369_v37, %v2108_v31  ;;  %vm2132_vm6 = vweird.f32 %v2369_v37  ;;  %vm4388_vm10 = vmmov %vm4382_vm0 }
 0x5ed   :  { %vm2133_vm4 = vmor %vm2131_vm13, %vm2132_vm6 }
 0x5ee   :  { %v2114_v2 = vmul.f32 %v2367_v41, %v2113_v24  ;;  %v2128_v22 = vsub.f32 1.0, %v2127_v17  ;;  %vm4389_vm1 = vmmov %vm4382_vm0 }
 0x5ef   :  { %vm4390_vm6 = vmmov %vm4382_vm0 }
 0x5f0   :  { %v2115_v6 = vadd.f32 %v2367_v41, %v2114_v2  ;;  %v2129_v21 = vmul.f32 %v2369_v37, %v2128_v22  ;;  %v2378_v22 = vld [vmem:[%s4133_s0 + $0x79] sm:$0xff]  ;;  %vm4393_vm13 = vmmov %vm4382_vm0 }
 0x5f2   :  { %v2119_v11 = vsel %vm2118_vm7, %v2367_v41, %v2115_v6  ;;  %v2130_v3 = vadd.f32 %v2369_v37, %v2129_v21  ;;  %v2376_v41 = vld [vmem:[%s4133_s0 + $0x61] sm:$0xff]  ;;  %v2379_v6 = vld [vmem:[%s4133_s0 + $0x11] sm:$0xff]  ;;  %vm4391_vm7 = vmmov %vm4382_vm0 }
 0x5f3   :  { %v2124_v54 = vsel %vm2121_vm9, %v2123_v50, %v2119_v11  ;;  %v2380_v11 = vld [vmem:[%s4133_s0 + $0x19] sm:$0xff]  ;;  %vm4392_vm9 = vmmov %vm4382_vm0 }
 0x5f4   :  { %v2125_v45 = vmul.f32 %v2365_v26, %v2124_v54  ;;  %v2134_v53 = vsel %vm2133_vm4, %v2369_v37, %v2130_v3  ;;  %v2377_v37 = vld [vmem:[%s4133_s0 + $0x9] sm:$0xff]  ;;  %vm4394_vm4 = vmmov %vm4382_vm0 }
 0x5f5   :  { %v2139_v4 = vsel %vm2136_vm3, %v2138_v28, %v2134_v53  ;;  %vm4395_vm3 = vmmov %vm4382_vm0 }
 0x5f6   :  { %v2141_v14 = vperm.slane %v2125_v45, 0  ;;  %v2140_v60 = vmul.f32 %v2363_v56, %v2139_v4  ;;  %v2381_v45 = vld [vmem:[%s4133_s0 + $0x21] sm:$0xff] }
 0x5f8   :  { %v2149_v0 = vmul.f32 %v2141_v14, %v3958_v15  ;;  %v2148_v52 = vmul.f32 %v2141_v14, %v3950_v62  ;;  %v2143_v51 = vmul.f32 %v2141_v14, %v3920_v59  ;;  %v2142_v63 = vperm.slane %v2140_v60, 0  ;;  %v2382_v60 = vld [vmem:[%s4133_s0 + $0x39] sm:$0xff] }
 0x5f9   :  { %v2144_v8 = vmul.f32 %v2141_v14, %v3914_v35  ;;  %v2145_v59 = vmul.f32 %v2141_v14, %v3922_v20  ;;  %v2146_v44 = vmul.f32 %v2141_v14, %v3930_v39  ;;  %v3995_v35 = vmul.f32 %v2141_v14, %v3970_v43 }
 0x5fa   :  { %2187 = vrot.lane.b32.xlu1 %v2149_v0, %s2398_s7  ;;  %2185 = vrot.lane.b32.xlu2 %v2148_v52, %s2398_s7  ;;  %v2154_v61 = vmul.f32 %v2142_v63, %v3926_v12  ;;  %v2153_v38 = vmul.f32 %v2142_v63, %v3918_v25  ;;  %v2157_v15 = vmul.f32 %v2142_v63, %v3954_v5  ;;  %v2371_v5 = vld [vmem:[%s4133_s0 + $0x29] sm:$0xff] }
 0x5fb   :  { %2175 = vrot.lane.b32.xlu0 %v2143_v51, %s2398_s7  ;;  %v2156_v62 = vmul.f32 %v2142_v63, %v3946_v19  ;;  %v3991_v12 = vmul.f32 %v2141_v14, %v3942_v29  ;;  %v3999_v25 = vmul.f32 %v2142_v63, %v3916_v57  ;;  %v4003_v20 = vmul.f32 %v2142_v63, %v3912_v27 }
 0x5fc   :  { %v4007_v39 = vmul.f32 %v2142_v63, %v3936_v58  ;;  %v4011_v29 = vmul.f32 %v2142_v63, %v3968_v16  ;;  %v2372_v16 = vld [vmem:[%s4133_s0 + $0x59] sm:$0xff]  ;;  %v2383_v63 = vld [vmem:[%s4133_s0 + $0x49] sm:$0xff] }
 0x602   :  { %2197 = vrot.lane.b32.xlu1 %v2154_v61, %s2398_s7  ;;  %2195 = vrot.lane.b32.xlu2 %v2153_v38, %s2398_s7 }
 0x603   :  { %2177 = vrot.lane.b32.xlu0 %v2144_v8, %s2398_s7 }
 0x60a   :  { %2203 = vrot.lane.b32.xlu1 %v2157_v15, %s2398_s7  ;;  %2201 = vrot.lane.b32.xlu2 %v2156_v62, %s2398_s7 }
 0x60b   :  { %2179 = vrot.lane.b32.xlu0 %v2145_v59, %s2398_s7 }
 0x613   :  { %2181 = vrot.lane.b32.xlu0 %v2146_v44, %s2398_s7 }
 0x61b   :  { %2183 = vrot.lane.b32.xlu0 %v3991_v12, %s2398_s7 }
 0x623   :  { %2189 = vrot.lane.b32.xlu0 %v3995_v35, %s2398_s7 }
 0x62b   :  { %2191 = vrot.lane.b32.xlu0 %v3999_v25, %s2398_s7 }
 0x633   :  { %2193 = vrot.lane.b32.xlu0 %v4003_v20, %s2398_s7 }
 0x63b   :  { %2199 = vrot.lane.b32.xlu0 %v4007_v39, %s2398_s7 }
 0x643   :  { %2205 = vrot.lane.b32.xlu0 %v4011_v29, %s2398_s7 }
 0x654   :  { %v2186_v19 = vpop.permute.xlu2 %2185 }
 0x655   :  { %v2228_v57 = vadd.f32 %v2186_v19, %v2148_v52  ;;  %v2386_v19 = vld [vmem:[%s4133_s0 + $0x81] sm:$0xff] }
 0x657   :  { %v2244_v27 = vadd.f32 %v2371_v5, %v2228_v57 }
 0x659   :  { %2260 = vst.msk [vmem:[%s4135_s8 + $0x29] sm:$0xff] %vm4380_vm11, %v2244_v27 }
 0x65c   :  { %v2196_v58 = vpop.permute.xlu2 %2195 }
 0x65d   :  { %v2233_v43 = vadd.f32 %v2196_v58, %v2153_v38 }
 0x65f   :  { %v2249_v9 = vadd.f32 %v2372_v16, %v2233_v43 }
 0x661   :  { %2265 = vst.msk [vmem:[%s4135_s8 + $0x59] sm:$0xff] %vm4381_vm12, %v2249_v9 }
 0x664   :  { %v2202_v10 = vpop.permute.xlu2 %2201 }
 0x665   :  { %v2236_v33 = vadd.f32 %v2202_v10, %v2156_v62 }
 0x667   :  { %v2252_v46 = vadd.f32 %v2373_v30, %v2236_v33 }
 0x669   :  { %2268 = vst.msk [vmem:[%s4135_s8 + $0x71] sm:$0xff] %vm4382_vm0, %v2252_v46 }
 0x66c   :  { %v2188_v49 = vpop.permute.xlu1 %2187 }
 0x66d   :  { %v2229_v55 = vadd.f32 %v2188_v49, %v2149_v0  ;;  %v2176_v32 = vpop.permute.xlu0 %2175 }
 0x66e   :  { %v2223_v47 = vadd.f32 %v2176_v32, %v2143_v51 }
 0x66f   :  { %v2245_v56 = vadd.f32 %v2374_v36, %v2229_v55 }
 0x670   :  { %v2239_v26 = vadd.f32 %v2375_v40, %v2223_v47 }
 0x671   :  { %2261 = vst.msk [vmem:[%s4135_s8 + $0x31] sm:$0xff] %vm4383_vm15, %v2245_v56 }
 0x672   :  { %2255 = vst.msk [vmem:[%s4135_s8 + $0x1] sm:$0xff] %vm4384_vm14, %v2239_v26 }
 0x674   :  { %v2198_v13 = vpop.permute.xlu1 %2197 }
 0x675   :  { %v2178_v42 = vpop.permute.xlu0 %2177  ;;  %v2234_v7 = vadd.f32 %v2198_v13, %v2154_v61 }
 0x676   :  { %v2224_v31 = vadd.f32 %v2178_v42, %v2144_v8 }
 0x677   :  { %v2250_v1 = vadd.f32 %v2376_v41, %v2234_v7 }
 0x678   :  { %v2240_v24 = vadd.f32 %v2377_v37, %v2224_v31 }
 0x679   :  { %2266 = vst.msk [vmem:[%s4135_s8 + $0x61] sm:$0xff] %vm4385_vm8, %v2250_v1 }
 0x67a   :  { %2256 = vst.msk [vmem:[%s4135_s8 + $0x9] sm:$0xff] %vm4386_vm2, %v2240_v24 }
 0x67c   :  { %v2204_v17 = vpop.permute.xlu1 %2203 }
 0x67d   :  { %v2180_v18 = vpop.permute.xlu0 %2179  ;;  %v2237_v2 = vadd.f32 %v2204_v17, %v2157_v15  ;;  %v2384_v15 = vld [vmem:[%s4133_s0 + $0x51] sm:$0xff] }
 0x67e   :  { %v2225_v34 = vadd.f32 %v2180_v18, %v2145_v59 }
 0x67f   :  { %v2253_v23 = vadd.f32 %v2378_v22, %v2237_v2 }
 0x680   :  { %v2241_v21 = vadd.f32 %v2379_v6, %v2225_v34 }
 0x681   :  { %2269 = vst.msk [vmem:[%s4135_s8 + $0x79] sm:$0xff] %vm4387_vm5, %v2253_v23 }
 0x682   :  { %2257 = vst.msk [vmem:[%s4135_s8 + $0x11] sm:$0xff] %vm4388_vm10, %v2241_v21 }
 0x685   :  { %v2182_v48 = vpop.permute.xlu0 %2181 }
 0x686   :  { %v2226_v50 = vadd.f32 %v2182_v48, %v2146_v44 }
 0x688   :  { %v2242_v3 = vadd.f32 %v2380_v11, %v2226_v50 }
 0x68a   :  { %2258 = vst.msk [vmem:[%s4135_s8 + $0x19] sm:$0xff] %vm4389_vm1, %v2242_v3 }
 0x68d   :  { %v2184_v54 = vpop.permute.xlu0 %2183 }
 0x68e   :  { %v2227_v28 = vadd.f32 %v2184_v54, %v3991_v12  ;;  %v2385_v12 = vld [vmem:[%s4133_s0 + $0x69] sm:$0xff] }
 0x690   :  { %v2243_v53 = vadd.f32 %v2381_v45, %v2227_v28 }
 0x692   :  { %2259 = vst.msk [vmem:[%s4135_s8 + $0x21] sm:$0xff] %vm4390_vm6, %v2243_v53 }
 0x695   :  { %v2190_v4 = vpop.permute.xlu0 %2189 }
 0x696   :  { %v2230_v14 = vadd.f32 %v2190_v4, %v3995_v35 }
 0x698   :  { %v2246_v0 = vadd.f32 %v2382_v60, %v2230_v14 }
 0x69a   :  { %2262 = vst.msk [vmem:[%s4135_s8 + $0x39] sm:$0xff] %vm4391_vm7, %v2246_v0 }
 0x69d   :  { %v2192_v52 = vpop.permute.xlu0 %2191 }
 0x69e   :  { %v2231_v51 = vadd.f32 %v2192_v52, %v3999_v25 }
 0x6a0   :  { %v2247_v61 = vadd.f32 %v2383_v63, %v2231_v51 }
 0x6a2   :  { %2263 = vst.msk [vmem:[%s4135_s8 + $0x49] sm:$0xff] %vm4392_vm9, %v2247_v61 }
 0x6a5   :  { %v2194_v38 = vpop.permute.xlu0 %2193 }
 0x6a6   :  { %v2232_v8 = vadd.f32 %v2194_v38, %v4003_v20 }
 0x6a8   :  { %v2248_v62 = vadd.f32 %v2384_v15, %v2232_v8 }
 0x6aa   :  { %2264 = vst.msk [vmem:[%s4135_s8 + $0x51] sm:$0xff] %vm4393_vm13, %v2248_v62 }
 0x6ad   :  { %v2200_v59 = vpop.permute.xlu0 %2199 }
 0x6ae   :  { %v2235_v44 = vadd.f32 %v2200_v59, %v4007_v39 }
 0x6b0   :  { %v2251_v35 = vadd.f32 %v2385_v12, %v2235_v44 }
 0x6b2   :  { %2267 = vst.msk [vmem:[%s4135_s8 + $0x69] sm:$0xff] %vm4394_vm4, %v2251_v35 }
 0x6b5   :  { %v2206_v25 = vpop.permute.xlu0 %2205 }
 0x6b6   :  { %v2238_v20 = vadd.f32 %v2206_v25, %v4011_v29 }
 0x6b8   :  { %v2254_v57 = vadd.f32 %v2386_v19, %v2238_v20 }
 0x6ba   :  { %2270 = vst.msk [vmem:[%s4135_s8 + $0x81] sm:$0xff] %vm4395_vm3, %v2254_v57 }

</bundles_post_ra>
